<compile_context>
chip_gen: v7x
topology: tpu7x:2x2x1
jax: 0.10.0
libtpu: 0.0.40
codegen_flags: <defaults>
</compile_context>

<pallas_src>
import functools

import jax
import jax.numpy as jnp
from jax.experimental import pallas as pl
from jax.experimental.pallas import tpu as pltpu


INPUT_DIM = 3          # xyz per point
C_PAD = 8              # pad the tiny xyz feature axis for clean TPU lowering
H1_PAD = 128           # layer-1 output padded 64 -> 128 (lane-dense, full K for layer 2)


# ----------------------------- Pallas kernel --------------------------------
def _traj_embedding_kernel(
    x_ref,                                              # (TN, C_PAD) bf16: one batch's point tile
    w1_ref, b1_ref, w2_ref, b2_ref, w3_ref, b3_ref,     # encoder shared MLP (w: bf16, b: f32)
    we_ref, be_ref,                                      # fc_embedding        (w: bf16, b: f32)
    feat_ref, z_ref,                                     # (1, d_feat), (1, d_emb) outputs
    *, n_valid, tile_points, needs_mask,
):
    t = pl.program_id(1)
    last = pl.num_programs(1) - 1

    # Shared per-point MLP: bf16 operands into the MXU, f32 accumulation,
    # f32 bias/ReLU epilogue (v5e VPU has no bf16).
    h = jnp.dot(x_ref[...], w1_ref[...], preferred_element_type=jnp.float32)
    h = jnp.maximum(h + b1_ref[...], 0.0)
    h = jnp.dot(h.astype(jnp.bfloat16), w2_ref[...],
                preferred_element_type=jnp.float32)
    h = jnp.maximum(h + b2_ref[...], 0.0)
    h = jnp.dot(h.astype(jnp.bfloat16), w3_ref[...],
                preferred_element_type=jnp.float32)
    h = jnp.maximum(h + b3_ref[...], 0.0)                # (TN, d_feat) f32

    if needs_mask:
        # Zero-fill point-axis padding rows. Exact for the max: ReLU output >= 0.
        row = t * tile_points + jax.lax.broadcasted_iota(jnp.int32, h.shape, 0)
        h = jnp.where(row < n_valid, h, 0.0)

    # Per-tile max over the point (sublane) axis; keep d_feat on lanes (VPU tree,
    # no lane-axis / XLU reduce).
    tile_max = jnp.max(h, axis=0, keepdims=True)         # (1, d_feat)

    # Running max accumulated in the output-resident feat block.
    @pl.when(t == 0)
    def _():
        feat_ref[...] = tile_max

    @pl.when(t > 0)
    def _():
        feat_ref[...] = jnp.maximum(feat_ref[...], tile_max)

    # fc_embedding exactly once per batch, gated to the last point tile.
    @pl.when(t == last)
    def _():
        z_ref[...] = jnp.dot(feat_ref[...].astype(jnp.bfloat16), we_ref[...],
                             preferred_element_type=jnp.float32) + be_ref[...]


# ------------------------------- wrapper -------------------------------------
def traj_embedding_forward(pc, params, *, tile_points=512):
    """Mirrors the traj-embedding forward: returns (z, point_feat)."""
    # ---- shape plumbing only (mirrors the torch forward) ----
    if pc.shape[-1] != 4096:
        pc = pc[..., 6:]                       # drop the 6 prepended gripper points
    feats = pc[:, :INPUT_DIM]                  # (B, 3, N)
    x = jnp.transpose(feats, (0, 2, 1))        # (B, N, 3) point-major
    B, N, C = x.shape

    TN = min(tile_points, N)                   # point-tile rows per grid step
    num_tiles = pl.cdiv(N, TN)
    n_pad = num_tiles * TN

    # bf16 input staging (half the HBM->VMEM DMA bytes); zero-pad features to
    # C_PAD and the point axis up to a tile multiple.
    # TODO(synk): the transpose/pad stays an XLA op; folding layer 1 into
    # channel-major VPU FMAs inside the kernel would drop this extra HBM slab.
    x = jnp.pad(x, ((0, 0), (0, n_pad - N), (0, C_PAD - C))).astype(jnp.bfloat16)

    w_names = ("w1", "b1", "w2", "b2", "w3", "b3", "we", "be")
    weight_args = [params[k] for k in w_names]

    d_feat = params["w3"].shape[1]
    d_emb = params["we"].shape[1]

    in_specs = [pl.BlockSpec((None, TN, C_PAD), lambda b, t: (b, t, 0))]
    # Constant index_map across both grid axes -> each weight DMA'd once and
    # kept VMEM-resident for the whole call.
    in_specs += [pl.BlockSpec(a.shape, lambda b, t: (0, 0)) for a in weight_args]

    out_specs = [
        pl.BlockSpec((None, 1, d_feat), lambda b, t: (b, 0, 0)),  # lane-dense 512
        pl.BlockSpec((None, 1, d_emb), lambda b, t: (b, 0, 0)),
    ]
    out_shape = (
        jax.ShapeDtypeStruct((B, 1, d_feat), jnp.float32),
        jax.ShapeDtypeStruct((B, 1, d_emb), jnp.float32),
    )

    kernel = functools.partial(
        _traj_embedding_kernel,
        n_valid=N, tile_points=TN, needs_mask=(N % TN != 0),
    )

    # Advisory cost estimate so XLA can overlap this microsecond-scale call.
    mm_flops_per_point = 2 * sum(
        int(params["w" + k].shape[0]) * int(params["w" + k].shape[1])
        for k in ("1", "2", "3"))
    flops = B * n_pad * mm_flops_per_point + 2 * B * d_feat * d_emb
    bytes_accessed = (
        int(x.size) * x.dtype.itemsize
        + sum(int(a.size) * a.dtype.itemsize for a in weight_args)
        + B * (d_feat + d_emb) * 4
    )
    cost = pl.CostEstimate(flops=int(flops), transcendentals=0,
                           bytes_accessed=int(bytes_accessed))

    feat, z = pl.pallas_call(
        kernel,
        out_shape=out_shape,
        grid_spec=pltpu.PrefetchScalarGridSpec(
            num_scalar_prefetch=0,
            grid=(B, num_tiles),       # batch: megacore-parallel; tiles: reduction
            in_specs=in_specs,
            out_specs=out_specs,
        ),
        compiler_params=pltpu.CompilerParams(
            dimension_semantics=("parallel", "arbitrary"),
            vmem_limit_bytes=32 * 1024 * 1024,   # explicit; fits all generations
        ),
        cost_estimate=cost,
    )(x, *weight_args)

    # torch forward returns the encoder embedding; point_feat is the pooled feature
    return z.reshape(B, d_emb), feat.reshape(B, d_feat)


# --------------------------- deterministic params ----------------------------
def init_params(key, input_dim=INPUT_DIM, model_scale=1, output_model_scale=1):
    d512 = int(model_scale * 512)
    dout = int(output_model_scale * 512)
    h1, h2 = 64, 128

    layer_dims = {
        "1": (input_dim, h1),       # encoder shared MLP
        "2": (h1, h2),
        "3": (h2, d512),
        "e": (d512, dout),          # fc_embedding
    }
    params = {}
    keys = jax.random.split(key, 2 * len(layer_dims))
    for i, (name, (din, dto)) in enumerate(layer_dims.items()):
        scale = 1.0 / jnp.sqrt(jnp.float32(din))
        params["w" + name] = jax.random.normal(keys[2 * i], (din, dto), jnp.float32) * scale
        params["b" + name] = jax.random.normal(keys[2 * i + 1], (1, dto), jnp.float32) * 0.01

    # --- TPU-friendly zero padding (exact numerics) ---
    # layer 1: pad input features 3 -> C_PAD (x padding cols are 0) and outputs
    # 64 -> 128 (padded bias cols are 0, ReLU(0)=0).
    params["w1"] = jnp.pad(params["w1"], ((0, C_PAD - input_dim), (0, H1_PAD - h1)))
    params["b1"] = jnp.pad(params["b1"], ((0, 0), (0, H1_PAD - h1)))
    # layer 2: zero rows for the padded hidden units (contribute nothing).
    params["w2"] = jnp.pad(params["w2"], ((0, H1_PAD - h1), (0, 0)))

    # matmul operands (weights) stream as bf16; biases stay f32 (f32 epilogue)
    for name in layer_dims:
        params["w" + name] = params["w" + name].astype(jnp.bfloat16)
    return params


# --------------------------------- main ---------------------------------------
if __name__ == "__main__":
    key = jax.random.PRNGKey(0)
    B, C_pc, N_total = 2, 4, 128 + 6           # 6 gripper points prepended, 128 object points
    pc = jax.random.normal(key, (B, C_pc, N_total), dtype=jnp.float32)

    params = init_params(jax.random.PRNGKey(1))

    z, point_feat = jax.jit(traj_embedding_forward)(pc, params)
    jax.block_until_ready((z, point_feat))

    assert z.shape == (B, 512), z.shape
    assert point_feat.shape == (B, 512), point_feat.shape
    assert jnp.all(jnp.isfinite(z)) and jnp.all(jnp.isfinite(point_feat))
    print("KERNEL_OK")
</pallas_src>

<mosaic_0001>
module attributes {stable_mosaic.version = 11 : i64} {
  func.func @_traj_embedding_kernel(%arg0: i32, %arg1: i32, %arg2: memref<1x128x8xbf16, #tpu.memory_space<vmem>>, %arg3: memref<8x128xbf16, #tpu.memory_space<vmem>>, %arg4: memref<1x128xf32, #tpu.memory_space<vmem>>, %arg5: memref<128x128xbf16, #tpu.memory_space<vmem>>, %arg6: memref<1x128xf32, #tpu.memory_space<vmem>>, %arg7: memref<128x512xbf16, #tpu.memory_space<vmem>>, %arg8: memref<1x512xf32, #tpu.memory_space<vmem>>, %arg9: memref<512x512xbf16, #tpu.memory_space<vmem>>, %arg10: memref<1x512xf32, #tpu.memory_space<vmem>>, %arg11: memref<1x1x512xf32, #tpu.memory_space<vmem>>, %arg12: memref<1x1x512xf32, #tpu.memory_space<vmem>>) attributes {dimension_semantics = [#tpu.dimension_semantics<parallel>, #tpu.dimension_semantics<arbitrary>], iteration_bounds = array<i64: 2, 1>, scalar_prefetch = 0 : i64, scratch_operands = 0 : i64, tpu.core_type = #tpu.core_type<tc>, window_params = [{transform_indices = @transform_0, window_bounds = array<i64: 1, 128, 8>}, {pipeline_mode = #tpu.pipeline_mode<synchronous>, transform_indices = @transform_1, window_bounds = array<i64: 8, 128>}, {pipeline_mode = #tpu.pipeline_mode<synchronous>, transform_indices = @transform_2, window_bounds = array<i64: 1, 128>}, {pipeline_mode = #tpu.pipeline_mode<synchronous>, transform_indices = @transform_3, window_bounds = array<i64: 128, 128>}, {pipeline_mode = #tpu.pipeline_mode<synchronous>, transform_indices = @transform_4, window_bounds = array<i64: 1, 128>}, {pipeline_mode = #tpu.pipeline_mode<synchronous>, transform_indices = @transform_5, window_bounds = array<i64: 128, 512>}, {pipeline_mode = #tpu.pipeline_mode<synchronous>, transform_indices = @transform_6, window_bounds = array<i64: 1, 512>}, {pipeline_mode = #tpu.pipeline_mode<synchronous>, transform_indices = @transform_7, window_bounds = array<i64: 512, 512>}, {pipeline_mode = #tpu.pipeline_mode<synchronous>, transform_indices = @transform_8, window_bounds = array<i64: 1, 512>}, {transform_indices = @transform_9, window_bounds = array<i64: 1, 1, 512>}, {transform_indices = @transform_10, window_bounds = array<i64: 1, 1, 512>}]} {
    %c0 = arith.constant 0 : index
    %c0_0 = arith.constant 0 : index
    %c0_1 = arith.constant 0 : index
    %0 = vector.load %arg2[%c0, %c0_0, %c0_1] : memref<1x128x8xbf16, #tpu.memory_space<vmem>>, vector<1x128x8xbf16>
    %1 = vector.shape_cast %0 : vector<1x128x8xbf16> to vector<128x8xbf16>
    %c0_2 = arith.constant 0 : index
    %c0_3 = arith.constant 0 : index
    %2 = vector.load %arg3[%c0_2, %c0_3] : memref<8x128xbf16, #tpu.memory_space<vmem>>, vector<8x128xbf16>
    %cst = arith.constant dense<0.000000e+00> : vector<128x128xf32>
    %3 = tpu.matmul %1, %2, %cst {dimension_numbers = #tpu.dot_dimension_numbers<[1], [0], [0], [1], [0, 0, 1, 1], [], []>} : vector<128x8xbf16>, vector<8x128xbf16>, vector<128x128xf32> -> vector<128x128xf32>
    %c0_4 = arith.constant 0 : index
    %c0_5 = arith.constant 0 : index
    %4 = vector.load %arg4[%c0_4, %c0_5] : memref<1x128xf32, #tpu.memory_space<vmem>>, vector<1x128xf32>
    %5 = vector.broadcast %4 : vector<1x128xf32> to vector<128x128xf32>
    %6 = arith.addf %3, %5 : vector<128x128xf32>
    %cst_6 = arith.constant 0.000000e+00 : f32
    %7 = vector.broadcast %cst_6 : f32 to vector<128x128xf32>
    %8 = arith.maximumf %6, %7 : vector<128x128xf32>
    %9 = arith.truncf %8 : vector<128x128xf32> to vector<128x128xbf16>
    %c0_7 = arith.constant 0 : index
    %c0_8 = arith.constant 0 : index
    %10 = vector.load %arg5[%c0_7, %c0_8] : memref<128x128xbf16, #tpu.memory_space<vmem>>, vector<128x128xbf16>
    %cst_9 = arith.constant dense<0.000000e+00> : vector<128x128xf32>
    %11 = tpu.matmul %9, %10, %cst_9 {dimension_numbers = #tpu.dot_dimension_numbers<[1], [0], [0], [1], [0, 0, 1, 1], [], []>} : vector<128x128xbf16>, vector<128x128xbf16>, vector<128x128xf32> -> vector<128x128xf32>
    %c0_10 = arith.constant 0 : index
    %c0_11 = arith.constant 0 : index
    %12 = vector.load %arg6[%c0_10, %c0_11] : memref<1x128xf32, #tpu.memory_space<vmem>>, vector<1x128xf32>
    %13 = vector.broadcast %12 : vector<1x128xf32> to vector<128x128xf32>
    %14 = arith.addf %11, %13 : vector<128x128xf32>
    %cst_12 = arith.constant 0.000000e+00 : f32
    %15 = vector.broadcast %cst_12 : f32 to vector<128x128xf32>
    %16 = arith.maximumf %14, %15 : vector<128x128xf32>
    %17 = arith.truncf %16 : vector<128x128xf32> to vector<128x128xbf16>
    %c0_13 = arith.constant 0 : index
    %c0_14 = arith.constant 0 : index
    %18 = vector.load %arg7[%c0_13, %c0_14] : memref<128x512xbf16, #tpu.memory_space<vmem>>, vector<128x512xbf16>
    %cst_15 = arith.constant dense<0.000000e+00> : vector<128x512xf32>
    %19 = tpu.matmul %17, %18, %cst_15 {dimension_numbers = #tpu.dot_dimension_numbers<[1], [0], [0], [1], [0, 0, 1, 1], [], []>} : vector<128x128xbf16>, vector<128x512xbf16>, vector<128x512xf32> -> vector<128x512xf32>
    %c0_16 = arith.constant 0 : index
    %c0_17 = arith.constant 0 : index
    %20 = vector.load %arg8[%c0_16, %c0_17] : memref<1x512xf32, #tpu.memory_space<vmem>>, vector<1x512xf32>
    %21 = vector.broadcast %20 : vector<1x512xf32> to vector<128x512xf32>
    %22 = arith.addf %19, %21 : vector<128x512xf32>
    %cst_18 = arith.constant 0.000000e+00 : f32
    %23 = vector.broadcast %cst_18 : f32 to vector<128x512xf32>
    %24 = arith.maximumf %22, %23 : vector<128x512xf32>
    %cst_19 = arith.constant dense<0xFF800000> : vector<512xf32>
    %25 = vector.multi_reduction <maximumf>, %24, %cst_19 [0] : vector<128x512xf32> to vector<512xf32>
    %26 = vector.shape_cast %25 : vector<512xf32> to vector<1x512xf32>
    %c0_i32 = arith.constant 0 : i32
    %27 = arith.cmpi eq, %arg1, %c0_i32 : i32
    %28 = arith.extui %27 : i1 to i32
    %c0_i32_20 = arith.constant 0 : i32
    %29 = arith.cmpi ne, %28, %c0_i32_20 : i32
    scf.if %29 {
      %c0_25 = arith.constant 0 : index
      %c0_26 = arith.constant 0 : index
      %c0_27 = arith.constant 0 : index
      %36 = vector.load %arg11[%c0_25, %c0_26, %c0_27] : memref<1x1x512xf32, #tpu.memory_space<vmem>>, vector<1x1x512xf32>
      %37 = vector.shape_cast %36 : vector<1x1x512xf32> to vector<1x512xf32>
      %38 = vector.shape_cast %26 : vector<1x512xf32> to vector<1x1x512xf32>
      tpu.vector_store %arg11[%c0_25, %c0_26, %c0_27], %38 {strides = array<i32>} : memref<1x1x512xf32, #tpu.memory_space<vmem>>, vector<1x1x512xf32>,
    } else {
    }
    %c0_i32_21 = arith.constant 0 : i32
    %30 = arith.cmpi sgt, %arg1, %c0_i32_21 : i32
    %31 = arith.extui %30 : i1 to i32
    %c0_i32_22 = arith.constant 0 : i32
    %32 = arith.cmpi ne, %31, %c0_i32_22 : i32
    scf.if %32 {
      %c0_25 = arith.constant 0 : index
      %c0_26 = arith.constant 0 : index
      %c0_27 = arith.constant 0 : index
      %36 = vector.load %arg11[%c0_25, %c0_26, %c0_27] : memref<1x1x512xf32, #tpu.memory_space<vmem>>, vector<1x1x512xf32>
      %37 = vector.shape_cast %36 : vector<1x1x512xf32> to vector<1x512xf32>
      %38 = arith.maximumf %37, %26 : vector<1x512xf32>
      %c0_28 = arith.constant 0 : index
      %c0_29 = arith.constant 0 : index
      %c0_30 = arith.constant 0 : index
      %39 = vector.load %arg11[%c0_28, %c0_29, %c0_30] : memref<1x1x512xf32, #tpu.memory_space<vmem>>, vector<1x1x512xf32>
      %40 = vector.shape_cast %39 : vector<1x1x512xf32> to vector<1x512xf32>
      %41 = vector.shape_cast %38 : vector<1x512xf32> to vector<1x1x512xf32>
      tpu.vector_store %arg11[%c0_28, %c0_29, %c0_30], %41 {strides = array<i32>} : memref<1x1x512xf32, #tpu.memory_space<vmem>>, vector<1x1x512xf32>,
    } else {
    }
    %c0_i32_23 = arith.constant 0 : i32
    %33 = arith.cmpi eq, %arg1, %c0_i32_23 : i32
    %34 = arith.extui %33 : i1 to i32
    %c0_i32_24 = arith.constant 0 : i32
    %35 = arith.cmpi ne, %34, %c0_i32_24 : i32
    scf.if %35 {
      %c0_25 = arith.constant 0 : index
      %c0_26 = arith.constant 0 : index
      %c0_27 = arith.constant 0 : index
      %36 = vector.load %arg11[%c0_25, %c0_26, %c0_27] : memref<1x1x512xf32, #tpu.memory_space<vmem>>, vector<1x1x512xf32>
      %37 = vector.shape_cast %36 : vector<1x1x512xf32> to vector<1x512xf32>
      %38 = arith.truncf %37 : vector<1x512xf32> to vector<1x512xbf16>
      %c0_28 = arith.constant 0 : index
      %c0_29 = arith.constant 0 : index
      %39 = vector.load %arg9[%c0_28, %c0_29] : memref<512x512xbf16, #tpu.memory_space<vmem>>, vector<512x512xbf16>
      %cst_30 = arith.constant dense<0.000000e+00> : vector<1x512xf32>
      %40 = tpu.matmul %38, %39, %cst_30 {dimension_numbers = #tpu.dot_dimension_numbers<[1], [0], [0], [1], [0, 0, 1, 1], [], []>} : vector<1x512xbf16>, vector<512x512xbf16>, vector<1x512xf32> -> vector<1x512xf32>
      %c0_31 = arith.constant 0 : index
      %c0_32 = arith.constant 0 : index
      %41 = vector.load %arg10[%c0_31, %c0_32] : memref<1x512xf32, #tpu.memory_space<vmem>>, vector<1x512xf32>
      %42 = arith.addf %40, %41 : vector<1x512xf32>
      %c0_33 = arith.constant 0 : index
      %c0_34 = arith.constant 0 : index
      %c0_35 = arith.constant 0 : index
      %43 = vector.load %arg12[%c0_33, %c0_34, %c0_35] : memref<1x1x512xf32, #tpu.memory_space<vmem>>, vector<1x1x512xf32>
      %44 = vector.shape_cast %43 : vector<1x1x512xf32> to vector<1x512xf32>
      %45 = vector.shape_cast %42 : vector<1x512xf32> to vector<1x1x512xf32>
      tpu.vector_store %arg12[%c0_33, %c0_34, %c0_35], %45 {strides = array<i32>} : memref<1x1x512xf32, #tpu.memory_space<vmem>>, vector<1x1x512xf32>,
    } else {
    }
    return
  }
  func.func @transform_0(%arg0: i32, %arg1: i32) -> (i32, i32, i32) {
    %c0_i32 = arith.constant 0 : i32
    %c0_i32_0 = arith.constant 0 : i32
    return %arg0, %arg1, %c0_i32 : i32, i32, i32
  }
  func.func @transform_1(%arg0: i32, %arg1: i32) -> (i32, i32) {
    %c0_i32 = arith.constant 0 : i32
    %c0_i32_0 = arith.constant 0 : i32
    %c0_i32_1 = arith.constant 0 : i32
    return %c0_i32, %c0_i32_0 : i32, i32
  }
  func.func @transform_2(%arg0: i32, %arg1: i32) -> (i32, i32) {
    %c0_i32 = arith.constant 0 : i32
    %c0_i32_0 = arith.constant 0 : i32
    %c0_i32_1 = arith.constant 0 : i32
    return %c0_i32, %c0_i32_0 : i32, i32
  }
  func.func @transform_3(%arg0: i32, %arg1: i32) -> (i32, i32) {
    %c0_i32 = arith.constant 0 : i32
    %c0_i32_0 = arith.constant 0 : i32
    %c0_i32_1 = arith.constant 0 : i32
    return %c0_i32, %c0_i32_0 : i32, i32
  }
  func.func @transform_4(%arg0: i32, %arg1: i32) -> (i32, i32) {
    %c0_i32 = arith.constant 0 : i32
    %c0_i32_0 = arith.constant 0 : i32
    %c0_i32_1 = arith.constant 0 : i32
    return %c0_i32, %c0_i32_0 : i32, i32
  }
  func.func @transform_5(%arg0: i32, %arg1: i32) -> (i32, i32) {
    %c0_i32 = arith.constant 0 : i32
    %c0_i32_0 = arith.constant 0 : i32
    %c0_i32_1 = arith.constant 0 : i32
    return %c0_i32, %c0_i32_0 : i32, i32
  }
  func.func @transform_6(%arg0: i32, %arg1: i32) -> (i32, i32) {
    %c0_i32 = arith.constant 0 : i32
    %c0_i32_0 = arith.constant 0 : i32
    %c0_i32_1 = arith.constant 0 : i32
    return %c0_i32, %c0_i32_0 : i32, i32
  }
  func.func @transform_7(%arg0: i32, %arg1: i32) -> (i32, i32) {
    %c0_i32 = arith.constant 0 : i32
    %c0_i32_0 = arith.constant 0 : i32
    %c0_i32_1 = arith.constant 0 : i32
    return %c0_i32, %c0_i32_0 : i32, i32
  }
  func.func @transform_8(%arg0: i32, %arg1: i32) -> (i32, i32) {
    %c0_i32 = arith.constant 0 : i32
    %c0_i32_0 = arith.constant 0 : i32
    %c0_i32_1 = arith.constant 0 : i32
    return %c0_i32, %c0_i32_0 : i32, i32
  }
  func.func @transform_9(%arg0: i32, %arg1: i32) -> (i32, i32, i32) {
    %c0_i32 = arith.constant 0 : i32
    %c0_i32_0 = arith.constant 0 : i32
    %c0_i32_1 = arith.constant 0 : i32
    return %arg0, %c0_i32, %c0_i32_0 : i32, i32, i32
  }
  func.func @transform_10(%arg0: i32, %arg1: i32) -> (i32, i32, i32) {
    %c0_i32 = arith.constant 0 : i32
    %c0_i32_0 = arith.constant 0 : i32
    %c0_i32_1 = arith.constant 0 : i32
    return %arg0, %c0_i32, %c0_i32_0 : i32, i32, i32
  }
}

</mosaic_0001>

<bundles_post_ra>
// kernel: traj_embedding_forward.1
= control target key start
LH: loop header
LB: loop body
LE: loop exit
PB: predicated region body
PF: predicated region fallthrough
CT: control target
= control target key end

     0   :  { %16 = vsyncpa [#allocation3], 0  ;;  %s3312_s13 = smov 0   ;;  %s3314_s14 = smov 0   ;;  %s3727_s0 = inlined_call_operand.vmem [shape: bf16[2,128,8], index: 0, kind: input, shape index: {}]   ;;  %s3728_s1 = inlined_call_operand.vmem [shape: bf16[8,128], index: 1, kind: input, shape index: {}]   ;;  %s3729_s2 = inlined_call_operand.vmem [shape: f32[1,128], index: 2, kind: input, shape index: {}]   ;;  %s3730_s3 = inlined_call_operand.vmem [shape: bf16[128,128], index: 3, kind: input, shape index: {}]   ;;  %s3731_s4 = inlined_call_operand.vmem [shape: f32[1,128], index: 4, kind: input, shape index: {}]   ;;  %s3732_s5 = inlined_call_operand.vmem [shape: bf16[128,512], index: 5, kind: input, shape index: {}]   ;;  %s3733_s6 = inlined_call_operand.vmem [shape: f32[1,512], index: 6, kind: input, shape index: {}]   ;;  %s3734_s7 = inlined_call_operand.hbm [shape: bf16[512,512], index: 7, kind: input, shape index: {}]   ;;  %s3735_s8 = inlined_call_operand.vmem [shape: f32[1,512], index: 8, kind: input, shape index: {}]   ;;  %s3736_s9 = inlined_call_operand.vmem [shape: f32[2,1,512], index: 9, kind: output, shape index: {0}]   ;;  %s3737_s10 = inlined_call_operand.vmem [shape: f32[2,1,512], index: 10, kind: output, shape index: {1}]  }
   0x1   :  { %s3316_s15 = smov 0  }
   0x2 LB: > { %s2613_s16 = sadd.s32 4294967295, %s3250_s15   ;;  %s34_s17 = sadd.s32 1, %s3246_s14  ;;  %s3250_s15 = sphi %s3316_s15, %s22_s15   ;;  %s3246_s14 = sphi %s3314_s14, %s3749_s14   ;;  %s3242_s13 = sphi %s3312_s13, %s3748_s13  }
   0x3   : > { %p36_p0 = scmp.ge.s32.totalorder %s34_s17, 2  ;;  %p2615_p1 = scmp.ge.s32.totalorder %s3250_s15, 1 }
   0x4   : > { %p287_p2 = scmp.lt.s32.totalorder %s3250_s15, 3  ;;  %p3337_p4 = scmp.eq.s32.totalorder %s2613_s16, 0 }
   0x5   : > { %s3751_s17 = smov (%p36_p0, %s34_s17), 0  ;;  %s3252_s20 = smov [#allocation2]  }
   0x6   : > { %p3333_p3 = pnand %p2615_p1, %p287_p2  ;;  %s317_s21 = sshll.u32 %s3252_s20, 4  ;;  %s318_s21 = int_to_ptr.vmem [resolvable:$true] %s317_s21 }
   0x7   : > { %s3742_s19 = scalar_select %p3337_p4, 1, 0 }
   0x8   : > { %s3741_s18 = scalar_select %p3333_p3, 1, 0 }
   0x9   : > { %p2905_p5 = pneg %p3333_p3  ;;  %s3196_s25 = scalar_lea.hbm %s3734_s7, 16384 }
   0xa   : > { %p3197_p7 = scmp.ne.s32.totalorder %s3734_s7, %s3196_s25  ;;  %p3203_p11 = scmp.lt.u32.totalorder %s3196_s25, %s3734_s7 }
   0xb   : > { %p3345_p6 = pnand %p3337_p4, %p2905_p5 }
   0xd   : > { %p3198_p8 = pneg %p3345_p6 }
   0xf   : > { %p3199_p9 = pnand %p3198_p8, %p3197_p7 }
  0x11   : > { %p3200_p10 = pneg %p3199_p9 }
  0x13   : > { %p3205_p12 = pnand %p3203_p11, %p3200_p10 }
  0x15   : > { %3208 = shalt.err (!%p3205_p12)
}
  0x16   : > { %s3209_s30 = scalar_lea.vmem %s318_s21, 16384  ;;  %p3217_p2 = scmp.lt.s32.totalorder %s318_s21, %s318_s21 }
  0x17   : > { %p3210_p13 = scmp.ne.s32.totalorder %s318_s21, %s3209_s30  ;;  %p3218_p5 = scmp.lt.s32.totalorder %s3209_s30, %s3209_s30 }
  0x19   : > { %p3212_p0 = pnand %p3210_p13, %p3198_p8  ;;  %p3219_p4 = por %p3218_p5, %p3217_p2 }
  0x1b   : > { %p3213_p1 = pneg %p3212_p0 }
  0x1d   : > { %p3220_p3 = pnand %p3219_p4, %p3213_p1 }
  0x1f   : > { %3223 = shalt.err (!%p3220_p3)
}
  0x20   : > { %s3253_s11 = smov 256   ;;  %s3254_s12 = smov 16  }
  0x21   : > { %2908 = dma.hbm_to_vmem [thread:$0]  (!%p3345_p6), %s3734_s7, 16384, %s318_s21, [#allocation3], %s3253_s11, %s3253_s11, %s3254_s12  }
  0x22   : > { %p3744_p7 = scmp.ne.s32.totalorder %s3741_s18, 0 }
  0x23   : > { %p3745_p9 = scmp.ne.s32.totalorder (!%p3744_p7), %s3742_s19, 0 }
  0x24   : > { %349 = sbr.rel (%p3744_p7) target bundleno = 1092 (0x444), region = 56 }
  0x2b   : > { %3237 = dma.done.wait (%p3745_p9), [#allocation3], 16384  }
  0x2c   : > { %3239 = vsyncadd (%p3745_p9), [#allocation3], 4294950912  ;;  %p395_p3 = scmp.lt.s32.totalorder %s3242_s13, 1  ;;  %vm502_vm0 = vcmask 1043456   ;;  %vm477_vm1 = vcmask 64512   ;;  %v2948_v7 = vld [vmem:[%s3730_s3] sm:$0xff]  }
  0x2d   : > { %v429_v0 = vld [vmem:[%s3728_s1] sm:$0xf]  ;;  %v2949_v8 = vld [vmem:[%s3730_s3 + $0x8] sm:$0xff]   ;;  %2856 = vmatprep.subr.bf16.mxu1 %v2948_v7  ;;  %v2950_v9 = vld [vmem:[%s3730_s3 + $0x10] sm:$0xff]  }
  0x2e   : > { %s3753_s13 = smov (!%p395_p3, %s3242_s13), 1  ;;  %2900 = vmatprep.subr.msk.bf16.mxu0 %vm502_vm0, %v429_v0  ;;  %v504_v1 = vsel %vm502_vm0, %v429_v0, 0  ;;  %2857 = vmatpush3.bf16.msra.mxu1 %v2948_v7  ;;  %v2951_v11 = vld [vmem:[%s3730_s3 + $0x18] sm:$0xff]   ;;  %v2952_v13 = vld [vmem:[%s3730_s3 + $0x20] sm:$0xff]   ;;  %v2953_v15 = vld [vmem:[%s3730_s3 + $0x28] sm:$0xff]  }
  0x2f   : > { %s2812_s22 = sshll.u32 %s3753_s13, 6  ;;  %2839 = vmatpush3.bf16.msra.mxu0 %v504_v1  ;;  %2858 = vmatprep.subr.bf16.mxu1 %v2949_v8  ;;  %v2954_v16 = vld [vmem:[%s3730_s3 + $0x30] sm:$0xff]   ;;  %v2955_v17 = vld [vmem:[%s3730_s3 + $0x38] sm:$0xff]   ;;  %v3466_v31 = vld [vmem:[%s3729_s2] ss:$0 sm:$0xff]  ;;  %s2622_s11 = sshll.u32 %s3753_s13, 2 }
  0x30   : > { %s3379_s21 = scalar_lea.vmem %s3727_s0, %s2812_s22  ;;  %v2956_v18 = vld [vmem:[%s3732_s5] ss:$16 sps:$4 sm:$0xff]   ;;  %v2958_v19 = vld [vmem:[%s3732_s5 + $0x4] ss:$16 sps:$4 sm:$0xff]   ;;  %v2961_v20 = vld [vmem:[%s3732_s5 + $0xc] ss:$16 sps:$4 sm:$0xff]   ;;  %s407_s20 = scalar_lea.vmem %s3736_s9, %s2622_s11 }
  0x31   : > { %v2940_v2 = vld [vmem:[%s3379_s21] sm:$0xff]   ;;  %v2941_v3 = vld [vmem:[%s3379_s21 + $0x8] sm:$0xff]   ;;  %v2942_v4 = vld [vmem:[%s3379_s21 + $0x10] sm:$0xff]   ;;  %1033 = vmatprep.subr.bf16.mxu0 %v2958_v19  ;;  %s411_s19 = scalar_lea.vmem %s3737_s10, %s2622_s11 }
  0x32   : > { %2840 = vmatprep.mubr.msk.bf16.mxu0 %vm477_vm1, %v2940_v2  ;;  %v2943_v5 = vld [vmem:[%s3379_s21 + $0x18] sm:$0xff]   ;;  %v2944_v6 = vld [vmem:[%s3379_s21 + $0x20] sm:$0xff]   ;;  %v2945_v10 = vld [vmem:[%s3379_s21 + $0x28] sm:$0xff]   ;;  %2859 = vmatpush3.bf16.msra.mxu1 %v2949_v8 }
  0x33   : > { %2841 = vmatmul.mubr.msk.bf16.vlgmr.msra.gmra.mrb[0].mxu0 %vm477_vm1, %v2941_v3  ;;  %v2946_v12 = vld [vmem:[%s3379_s21 + $0x30] sm:$0xff]   ;;  %2860 = vmatprep.subr.bf16.mxu1 %v2950_v9  ;;  %v2947_v14 = vld [vmem:[%s3379_s21 + $0x38] sm:$0xff]  }
  0x34   : > { %2844 = vmatprep.mubr.msk.bf16.mxu0 %vm477_vm1, %v2942_v4  ;;  %v2964_v21 = vld [vmem:[%s3732_s5 + $0x24] ss:$16 sps:$4 sm:$0xff]   ;;  %1034 = vmatpush1.bf16.msra.mxu0 %v2956_v18  ;;  %v2962_v22 = vld [vmem:[%s3732_s5 + $0x20] ss:$16 sps:$4 sm:$0xff]   ;;  %v2959_v47 = vld [vmem:[%s3732_s5 + $0x8] ss:$16 sps:$4 sm:$0xff]  }
  0x35   : > { %1035 = vmatprep.subr.bf16.mxu0 %v2964_v21  ;;  %v2970_v23 = vld [vmem:[%s3732_s5 + $0x44] ss:$16 sps:$4 sm:$0xff]   ;;  %v2968_v24 = vld [vmem:[%s3732_s5 + $0x40] ss:$16 sps:$4 sm:$0xff]   ;;  %v2967_v50 = vld [vmem:[%s3732_s5 + $0x2c] ss:$16 sps:$4 sm:$0xff]  }
  0x36   : > { %2861 = vmatpush3.bf16.msra.mxu1 %v2950_v9  ;;  %v2976_v25 = vld [vmem:[%s3732_s5 + $0x64] ss:$16 sps:$4 sm:$0xff]   ;;  %v2974_v26 = vld [vmem:[%s3732_s5 + $0x60] ss:$16 sps:$4 sm:$0xff]   ;;  %v2965_v58 = vld [vmem:[%s3732_s5 + $0x28] ss:$16 sps:$4 sm:$0xff]  }
  0x37   : > { %2862 = vmatprep.subr.bf16.mxu1 %v2951_v11  ;;  %v2982_v27 = vld [vmem:[%s3732_s5 + $0x84] ss:$16 sps:$4 sm:$0xff]   ;;  %v2980_v28 = vld [vmem:[%s3732_s5 + $0x80] ss:$16 sps:$4 sm:$0xff]   ;;  %v2973_v60 = vld [vmem:[%s3732_s5 + $0x4c] ss:$16 sps:$4 sm:$0xff]  }
  0x38   : > { %1036 = vmatpush1.bf16.msra.mxu0 %v2962_v22  ;;  %v2988_v29 = vld [vmem:[%s3732_s5 + $0xa4] ss:$16 sps:$4 sm:$0xff]   ;;  %v2986_v30 = vld [vmem:[%s3732_s5 + $0xa0] ss:$16 sps:$4 sm:$0xff]   ;;  %v2971_v1 = vld [vmem:[%s3732_s5 + $0x48] ss:$16 sps:$4 sm:$0xff]  }
  0x39   : > { %1037 = vmatprep.subr.bf16.mxu0 %v2970_v23  ;;  %v2979_v4 = vld [vmem:[%s3732_s5 + $0x6c] ss:$16 sps:$4 sm:$0xff]   ;;  %v2983_v19 = vld [vmem:[%s3732_s5 + $0x88] ss:$16 sps:$4 sm:$0xff]  }
  0x3a   : > { %2863 = vmatpush3.bf16.msra.mxu1 %v2951_v11  ;;  %v2991_v22 = vld [vmem:[%s3732_s5 + $0xac] ss:$16 sps:$4 sm:$0xff]  }
  0x3b   : > { %2845 = vmatmul.mubr.msk.bf16.gmra.mrb[4].mxu0 %vm477_vm1, %v2943_v5  ;;  %2864 = vmatprep.subr.bf16.mxu1 %v2952_v13 }
  0x3c   : > { %2848 = vmatprep.mubr.msk.bf16.mxu0 %vm477_vm1, %v2944_v6  ;;  %1038 = vmatpush1.bf16.msra.mxu0 %v2968_v24 }
  0x3d   : > { %1039 = vmatprep.subr.bf16.mxu0 %v2976_v25 }
  0x3e   : > { %2865 = vmatpush3.bf16.msra.mxu1 %v2952_v13 }
  0x3f   : > { %2866 = vmatprep.subr.bf16.mxu1 %v2953_v15 }
  0x40   : > { %1040 = vmatpush1.bf16.msra.mxu0 %v2974_v26 }
  0x41   : > { %1041 = vmatprep.subr.bf16.mxu0 %v2982_v27 }
  0x42   : > { %2867 = vmatpush3.bf16.msra.mxu1 %v2953_v15 }
  0x43   : > { %2849 = vmatmul.mubr.msk.bf16.gmra.mrb[8].mxu0 %vm477_vm1, %v2945_v10  ;;  %2868 = vmatprep.subr.bf16.mxu1 %v2954_v16 }
  0x44   : > { %2852 = vmatprep.mubr.msk.bf16.mxu0 %vm477_vm1, %v2946_v12  ;;  %1042 = vmatpush1.bf16.msra.mxu0 %v2980_v28  ;;  %v2977_v12 = vld [vmem:[%s3732_s5 + $0x68] ss:$16 sps:$4 sm:$0xff]  }
  0x45   : > { %1043 = vmatprep.subr.bf16.mxu0 %v2988_v29 }
  0x46   : > { %2869 = vmatpush3.bf16.msra.mxu1 %v2954_v16 }
  0x47   : > { %2870 = vmatprep.subr.bf16.mxu1 %v2955_v17 }
  0x48   : > { %1044 = vmatpush1.bf16.msra.mxu0 %v2986_v30  ;;  %v2989_v30 = vld [vmem:[%s3732_s5 + $0xa8] ss:$16 sps:$4 sm:$0xff]  }
  0x4a   : > { %2871 = vmatpush3.bf16.msra.mxu1 %v2955_v17 }
  0x4b   : > { %2853 = vmatmul.mubr.msk.bf16.gmra.mrb[12].mxu0 %vm477_vm1, %v2947_v14  ;;  %1146 = vmatprep.subr.bf16.mxu1 %v2961_v20  ;;  %v2985_v14 = vld [vmem:[%s3732_s5 + $0x8c] ss:$16 sps:$4 sm:$0xff]  }
 0x106   : > { %v2842_v32 = vpop.f32.mrb[0].mxu0 }
 0x107   : > { %v549_v33 = vadd.f32 %v2842_v32, %v3466_v31  ;;  %v540_v34 = vpop.f32.mrb[1].mxu0 }
 0x108   : > { %v541_v35 = vadd.f32 %v3466_v31, %v540_v34  ;;  %v2843_v36 = vpop.f32.mrb[2].mxu0 }
 0x109   : > { %v552_v37 = vadd.f32 %v2843_v36, %v3466_v31  ;;  %v543_v38 = vpop.f32.mrb[3].mxu0  ;;  %v605_v40 = vmax.f32 %v549_v33, 0.0  ;;  %v2994_v36 = vld [vmem:[%s3732_s5 + $0xc4] ss:$16 sps:$4 sm:$0xff]  }
 0x10a   : > { %v544_v39 = vadd.f32 %v3466_v31, %v543_v38  ;;  %v603_v42 = vmax.f32 %v541_v35, 0.0  ;;  %v2995_v38 = vld [vmem:[%s3732_s5 + $0xc8] ss:$16 sps:$4 sm:$0xff]   ;;  %1045 = vmatprep.subr.bf16.mxu0 %v2994_v36 }
 0x10b   : > { %v606_v41 = vmax.f32 %v552_v37, 0.0  ;;  %v2992_v37 = vld [vmem:[%s3732_s5 + $0xc0] ss:$16 sps:$4 sm:$0xff]  }
 0x10c   : > { %v604_v43 = vmax.f32 %v544_v39, 0.0  ;;  %1046 = vmatpush1.bf16.msra.mxu0 %v2992_v37  ;;  %v3000_v39 = vld [vmem:[%s3732_s5 + $0xe4] ss:$16 sps:$4 sm:$0xff]  }
 0x10d   : > { %v620_v44 = vpack.c.bf16 %v606_v41, %v605_v40  ;;  %v3003_v40 = vld [vmem:[%s3732_s5 + $0xec] ss:$16 sps:$4 sm:$0xff]   ;;  %v2998_v41 = vld [vmem:[%s3732_s5 + $0xe0] ss:$16 sps:$4 sm:$0xff]   ;;  %1047 = vmatprep.subr.bf16.mxu0 %v3000_v39  ;;  %v3006_v37 = vld [vmem:[#allocation2 + $0x4] ss:$16 sps:$4 sm:$0xff]  }
 0x10e   : > { %v2846_v45 = vpop.f32.mrb[4].mxu0  ;;  %v619_v46 = vpack.c.bf16 %v604_v43, %v603_v42  ;;  %v3001_v42 = vld [vmem:[%s3732_s5 + $0xe8] ss:$16 sps:$4 sm:$0xff]   ;;  %v3255_v43 = vmov 0   ;;  %v3004_v39 = vld [vmem:[#allocation2] ss:$16 sps:$4 sm:$0xff]  }
 0x10f   : > { %v565_v48 = vadd.f32 %v2846_v45, %v3466_v31  ;;  %v556_v49 = vpop.f32.mrb[5].mxu0  ;;  %1065 = vmatprep.mubr.bf16.mxu0 %v3255_v43 }
 0x110   : > { %v557_v51 = vadd.f32 %v3466_v31, %v556_v49  ;;  %2872 = vmatprep.mubr.bf16.mxu1 %v619_v46  ;;  %v2847_v52 = vpop.f32.mrb[6].mxu0  ;;  %1048 = vmatpush1.bf16.msra.mxu0 %v2998_v41  ;;  %v3012_v41 = vld [vmem:[#allocation2 + $0x24] ss:$16 sps:$4 sm:$0xff]  }
 0x111   : > { %v609_v53 = vmax.f32 %v565_v48, 0.0  ;;  %v568_v54 = vadd.f32 %v2847_v52, %v3466_v31  ;;  %2873 = vmatmul.mubr.bf16.vlgmr.msra.gmra.mrb[0].mxu1 %v620_v44  ;;  %v559_v55 = vpop.f32.mrb[7].mxu0  ;;  %v3546_v44 = vld [vmem:[%s3731_s4] ss:$0 sm:$0xff]  ;;  %2304 = vmatprep.subr.bf16.mxu0 %v3006_v37  ;;  %v3102_v37 = vld [vmem:[#allocation2 + $0x204] ss:$16 sps:$4 sm:$0xff]  }
 0x112   : > { %v607_v56 = vmax.f32 %v557_v51, 0.0  ;;  %v560_v57 = vadd.f32 %v3466_v31, %v559_v55  ;;  %1147 = vmatpush1.bf16.msra.mxu1 %v2959_v47 }
 0x113   : > { %v610_v59 = vmax.f32 %v568_v54, 0.0  ;;  %1148 = vmatprep.subr.bf16.mxu1 %v2967_v50 }
 0x114   : > { %v608_v61 = vmax.f32 %v560_v57, 0.0 }
 0x115   : > { %v622_v62 = vpack.c.bf16 %v610_v59, %v609_v53 }
 0x116   : > { %v621_v63 = vpack.c.bf16 %v608_v61, %v607_v56  ;;  %v2850_v0 = vpop.f32.mrb[8].mxu0  ;;  %1149 = vmatpush1.bf16.msra.mxu1 %v2965_v58 }
 0x117   : > { %v581_v2 = vadd.f32 %v2850_v0, %v3466_v31  ;;  %v572_v3 = vpop.f32.mrb[9].mxu0  ;;  %1150 = vmatprep.subr.bf16.mxu1 %v2973_v60 }
 0x118   : > { %2876 = vmatprep.mubr.bf16.mxu1 %v621_v63  ;;  %v573_v5 = vadd.f32 %v3466_v31, %v572_v3  ;;  %v2851_v6 = vpop.f32.mrb[10].mxu0 }
 0x119   : > { %2877 = vmatmul.mubr.bf16.gmra.mrb[4].mxu1 %v622_v62  ;;  %v613_v7 = vmax.f32 %v581_v2, 0.0  ;;  %v584_v8 = vadd.f32 %v2851_v6, %v3466_v31  ;;  %v575_v9 = vpop.f32.mrb[11].mxu0 }
 0x11a   : > { %v611_v10 = vmax.f32 %v573_v5, 0.0  ;;  %v576_v11 = vadd.f32 %v3466_v31, %v575_v9  ;;  %1151 = vmatpush1.bf16.msra.mxu1 %v2971_v1 }
 0x11b   : > { %v614_v13 = vmax.f32 %v584_v8, 0.0  ;;  %1152 = vmatprep.subr.bf16.mxu1 %v2979_v4 }
 0x11c   : > { %v612_v15 = vmax.f32 %v576_v11, 0.0 }
 0x11d   : > { %v624_v16 = vpack.c.bf16 %v614_v13, %v613_v7 }
 0x11e   : > { %v623_v17 = vpack.c.bf16 %v612_v15, %v611_v10  ;;  %v2854_v18 = vpop.f32.mrb[12].mxu0  ;;  %1153 = vmatpush1.bf16.msra.mxu1 %v2977_v12 }
 0x11f   : > { %v597_v20 = vadd.f32 %v2854_v18, %v3466_v31  ;;  %v588_v21 = vpop.f32.mrb[13].mxu0  ;;  %1154 = vmatprep.subr.bf16.mxu1 %v2985_v14 }
 0x120   : > { %2880 = vmatprep.mubr.bf16.mxu1 %v623_v17  ;;  %v589_v23 = vadd.f32 %v3466_v31, %v588_v21  ;;  %v2855_v24 = vpop.f32.mrb[14].mxu0 }
 0x121   : > { %2881 = vmatmul.mubr.bf16.gmra.mrb[8].mxu1 %v624_v16  ;;  %v617_v25 = vmax.f32 %v597_v20, 0.0  ;;  %v600_v26 = vadd.f32 %v2855_v24, %v3466_v31  ;;  %v591_v27 = vpop.f32.mrb[15].mxu0 }
 0x122   : > { %v615_v28 = vmax.f32 %v589_v23, 0.0  ;;  %v592_v29 = vadd.f32 %v3466_v31, %v591_v27  ;;  %1155 = vmatpush1.bf16.msra.mxu1 %v2983_v19  ;;  %v2997_v31 = vld [vmem:[%s3732_s5 + $0xcc] ss:$16 sps:$4 sm:$0xff]  }
 0x123   : > { %v618_v32 = vmax.f32 %v600_v26, 0.0  ;;  %1156 = vmatprep.subr.bf16.mxu1 %v2991_v22 }
 0x124   : > { %v616_v33 = vmax.f32 %v592_v29, 0.0 }
 0x125   : > { %v626_v34 = vpack.c.bf16 %v618_v32, %v617_v25 }
 0x126   : > { %v625_v35 = vpack.c.bf16 %v616_v33, %v615_v28  ;;  %1157 = vmatpush1.bf16.msra.mxu1 %v2989_v30 }
 0x127   : > { %1158 = vmatprep.subr.bf16.mxu1 %v2997_v31 }
 0x128   : > { %2884 = vmatprep.mubr.bf16.mxu1 %v625_v35 }
 0x129   : > { %2885 = vmatmul.mubr.bf16.gmra.mrb[12].mxu1 %v626_v34 }
 0x12a   : > { %1159 = vmatpush1.bf16.msra.mxu1 %v2995_v38  ;;  %1178 = vmatprep.mubr.bf16.mxu1 %v3255_v43  ;;  %v3009_v38 = vld [vmem:[#allocation2 + $0xc] ss:$16 sps:$4 sm:$0xff]  }
 0x12b   : > { %1160 = vmatprep.subr.bf16.mxu1 %v3003_v40  ;;  %v3007_v40 = vld [vmem:[#allocation2 + $0x8] ss:$16 sps:$4 sm:$0xff]  }
 0x12e   : > { %1161 = vmatpush1.bf16.msra.mxu1 %v3001_v42  ;;  %v3015_v42 = vld [vmem:[#allocation2 + $0x2c] ss:$16 sps:$4 sm:$0xff]  }
 0x12f   : > { %2386 = vmatprep.subr.bf16.mxu1 %v3009_v38  ;;  %v3105_v38 = vld [vmem:[#allocation2 + $0x20c] ss:$16 sps:$4 sm:$0xff]  }
 0x1e4   : > { %v2874_v45 = vpop.f32.mrb[0].mxu1 }
 0x1e5   : > { %v741_v46 = vadd.f32 %v2874_v45, %v3546_v44  ;;  %v732_v47 = vpop.f32.mrb[1].mxu1  ;;  %v3013_v45 = vld [vmem:[#allocation2 + $0x28] ss:$16 sps:$4 sm:$0xff]  }
 0x1e6   : > { %v733_v48 = vadd.f32 %v3546_v44, %v732_v47  ;;  %v2875_v49 = vpop.f32.mrb[2].mxu1  ;;  %v3016_v47 = vld [vmem:[#allocation2 + $0x40] ss:$16 sps:$4 sm:$0xff]  }
 0x1e7   : > { %v744_v50 = vadd.f32 %v2875_v49, %v3546_v44  ;;  %v735_v51 = vpop.f32.mrb[3].mxu1  ;;  %v797_v53 = vmax.f32 %v741_v46, 0.0  ;;  %v3018_v46 = vld [vmem:[#allocation2 + $0x44] ss:$16 sps:$4 sm:$0xff]  }
 0x1e8   : > { %v736_v52 = vadd.f32 %v3546_v44, %v735_v51  ;;  %v795_v55 = vmax.f32 %v733_v48, 0.0  ;;  %v3019_v48 = vld [vmem:[#allocation2 + $0x48] ss:$16 sps:$4 sm:$0xff]   ;;  %v3024_v49 = vld [vmem:[#allocation2 + $0x64] ss:$16 sps:$4 sm:$0xff]  }
 0x1e9   : > { %v798_v54 = vmax.f32 %v744_v50, 0.0  ;;  %v3027_v50 = vld [vmem:[#allocation2 + $0x6c] ss:$16 sps:$4 sm:$0xff]   ;;  %v3022_v51 = vld [vmem:[#allocation2 + $0x60] ss:$16 sps:$4 sm:$0xff]  }
 0x1ea   : > { %v796_v56 = vmax.f32 %v736_v52, 0.0  ;;  %v3025_v52 = vld [vmem:[#allocation2 + $0x68] ss:$16 sps:$4 sm:$0xff]  }
 0x1eb   : > { %v812_v57 = vpack.c.bf16 %v798_v54, %v797_v53  ;;  %v3030_v53 = vld [vmem:[#allocation2 + $0x84] ss:$16 sps:$4 sm:$0xff]   ;;  %v3033_v54 = vld [vmem:[#allocation2 + $0x8c] ss:$16 sps:$4 sm:$0xff]  }
 0x1ec   : > { %v811_v58 = vpack.c.bf16 %v796_v56, %v795_v55  ;;  %v2878_v59 = vpop.f32.mrb[4].mxu1  ;;  %v3028_v55 = vld [vmem:[#allocation2 + $0x80] ss:$16 sps:$4 sm:$0xff]   ;;  %v3031_v56 = vld [vmem:[#allocation2 + $0x88] ss:$16 sps:$4 sm:$0xff]  }
 0x1ed   : > { %v757_v60 = vadd.f32 %v2878_v59, %v3546_v44  ;;  %v748_v61 = vpop.f32.mrb[5].mxu1  ;;  %v3034_v59 = vld [vmem:[#allocation2 + $0xa0] ss:$16 sps:$4 sm:$0xff]  }
 0x1ee   : > { %v749_v62 = vadd.f32 %v3546_v44, %v748_v61  ;;  %1066 = vmatmul.mubr.bf16.vlgmr.msra.gmra.mrb[16].mxu0 %v811_v58  ;;  %1179 = vmatmul.mubr.bf16.vlgmr.msra.gmra.mrb[16].mxu1 %v811_v58  ;;  %v2879_v63 = vpop.f32.mrb[6].mxu1  ;;  %v3039_v58 = vld [vmem:[#allocation2 + $0xac] ss:$16 sps:$4 sm:$0xff]   ;;  %v3042_v61 = vld [vmem:[#allocation2 + $0xc4] ss:$16 sps:$4 sm:$0xff]  }
 0x1ef   : > { %v801_v0 = vmax.f32 %v757_v60, 0.0  ;;  %v760_v1 = vadd.f32 %v2879_v63, %v3546_v44  ;;  %v751_v2 = vpop.f32.mrb[7].mxu1  ;;  %1075 = vmatprep.mubr.bf16.mxu0 %v3255_v43  ;;  %1188 = vmatprep.mubr.bf16.mxu1 %v3255_v43  ;;  %v3037_v60 = vld [vmem:[#allocation2 + $0xa8] ss:$16 sps:$4 sm:$0xff]   ;;  %v3040_v63 = vld [vmem:[#allocation2 + $0xc0] ss:$16 sps:$4 sm:$0xff]  }
 0x1f0   : > { %v799_v3 = vmax.f32 %v749_v62, 0.0  ;;  %v752_v4 = vadd.f32 %v3546_v44, %v751_v2  ;;  %2305 = vmatpush1.bf16.msra.mxu0 %v3004_v39  ;;  %2387 = vmatpush1.bf16.msra.mxu1 %v3007_v40  ;;  %v3045_v62 = vld [vmem:[#allocation2 + $0xcc] ss:$16 sps:$4 sm:$0xff]   ;;  %v853_v39 = vlaneseq }
 0x1f1   : > { %v802_v5 = vmax.f32 %v760_v1, 0.0  ;;  %2306 = vmatprep.subr.bf16.mxu0 %v3012_v41  ;;  %2388 = vmatprep.subr.bf16.mxu1 %v3015_v42  ;;  %v3048_v1 = vld [vmem:[#allocation2 + $0xe4] ss:$16 sps:$4 sm:$0xff]   ;;  %v3051_v2 = vld [vmem:[#allocation2 + $0xec] ss:$16 sps:$4 sm:$0xff]  }
 0x1f2   : > { %v800_v6 = vmax.f32 %v752_v4, 0.0  ;;  %v3049_v4 = vld [vmem:[#allocation2 + $0xe8] ss:$16 sps:$4 sm:$0xff]   ;;  %v3579_v40 = vshrl.u32 %v853_v39, 7  ;;  %vm3684_vm2 = vcmp.lt.s32.totalorder %v853_v39, 512 }
 0x1f3   : > { %v814_v7 = vpack.c.bf16 %v802_v5, %v801_v0  ;;  %v3043_v0 = vld [vmem:[#allocation2 + $0xc8] ss:$16 sps:$4 sm:$0xff]   ;;  %v3054_v5 = vld [vmem:[#allocation2 + $0x104] ss:$16 sps:$4 sm:$0xff]  }
 0x1f4   : > { %v813_v8 = vpack.c.bf16 %v800_v6, %v799_v3  ;;  %v2882_v9 = vpop.f32.mrb[8].mxu1  ;;  %2389 = vmatpush1.bf16.msra.mxu1 %v3013_v45  ;;  %v3046_v3 = vld [vmem:[#allocation2 + $0xe0] ss:$16 sps:$4 sm:$0xff]   ;;  %v3057_v6 = vld [vmem:[#allocation2 + $0x10c] ss:$16 sps:$4 sm:$0xff]   ;;  %v3582_v41 = vsub.s32 0, %v3579_v40 }
 0x1f5   : > { %v773_v10 = vadd.f32 %v2882_v9, %v3546_v44  ;;  %v764_v11 = vpop.f32.mrb[9].mxu1  ;;  %v3060_v9 = vld [vmem:[#allocation2 + $0x124] ss:$16 sps:$4 sm:$0xff]   ;;  %v3585_v42 = vsub.s32 2, %v3579_v40  ;;  %v3591_v45 = vsub.s32 1, %v3579_v40 }
 0x1f6   : > { %1076 = vmatmul.mubr.bf16.gmra.mrb[20].mxu0 %v812_v57  ;;  %1189 = vmatmul.mubr.bf16.gmra.mrb[20].mxu1 %v812_v57  ;;  %v765_v12 = vadd.f32 %v3546_v44, %v764_v11  ;;  %v2883_v13 = vpop.f32.mrb[10].mxu1  ;;  %v3036_v57 = vld [vmem:[#allocation2 + $0xa4] ss:$16 sps:$4 sm:$0xff]   ;;  %v3058_v11 = vld [vmem:[#allocation2 + $0x120] ss:$16 sps:$4 sm:$0xff]  }
 0x1f7   : > { %v805_v14 = vmax.f32 %v773_v10, 0.0  ;;  %1085 = vmatprep.mubr.bf16.mxu0 %v3255_v43  ;;  %1198 = vmatprep.mubr.bf16.mxu1 %v3255_v43  ;;  %v776_v15 = vadd.f32 %v2883_v13, %v3546_v44  ;;  %v767_v16 = vpop.f32.mrb[11].mxu1  ;;  %v3063_v10 = vld [vmem:[#allocation2 + $0x12c] ss:$16 sps:$4 sm:$0xff]   ;;  %v3066_v13 = vld [vmem:[#allocation2 + $0x144] ss:$16 sps:$4 sm:$0xff]  }
 0x1f8   : > { %v803_v17 = vmax.f32 %v765_v12, 0.0  ;;  %v768_v18 = vadd.f32 %v3546_v44, %v767_v16  ;;  %v3061_v12 = vld [vmem:[#allocation2 + $0x128] ss:$16 sps:$4 sm:$0xff]  }
 0x1f9   : > { %v806_v19 = vmax.f32 %v776_v15, 0.0  ;;  %v3064_v15 = vld [vmem:[#allocation2 + $0x140] ss:$16 sps:$4 sm:$0xff]   ;;  %v3067_v16 = vld [vmem:[#allocation2 + $0x148] ss:$16 sps:$4 sm:$0xff]  }
 0x1fa   : > { %v804_v20 = vmax.f32 %v768_v18, 0.0  ;;  %v3075_v18 = vld [vmem:[#allocation2 + $0x16c] ss:$16 sps:$4 sm:$0xff]  }
 0x1fb   : > { %v816_v21 = vpack.c.bf16 %v806_v19, %v805_v14  ;;  %v3069_v14 = vld [vmem:[#allocation2 + $0x14c] ss:$16 sps:$4 sm:$0xff]   ;;  %v3070_v19 = vld [vmem:[#allocation2 + $0x160] ss:$16 sps:$4 sm:$0xff]  }
 0x1fc   : > { %v815_v22 = vpack.c.bf16 %v804_v20, %v803_v17  ;;  %v2886_v23 = vpop.f32.mrb[12].mxu1  ;;  %v3072_v17 = vld [vmem:[#allocation2 + $0x164] ss:$16 sps:$4 sm:$0xff]   ;;  %v3073_v20 = vld [vmem:[#allocation2 + $0x168] ss:$16 sps:$4 sm:$0xff]  }
 0x1fd   : > { %v789_v24 = vadd.f32 %v2886_v23, %v3546_v44  ;;  %v780_v25 = vpop.f32.mrb[13].mxu1  ;;  %v3076_v23 = vld [vmem:[#allocation2 + $0x180] ss:$16 sps:$4 sm:$0xff]  }
 0x1fe   : > { %1086 = vmatmul.mubr.bf16.gmra.mrb[24].mxu0 %v813_v8  ;;  %1199 = vmatmul.mubr.bf16.gmra.mrb[24].mxu1 %v813_v8  ;;  %v781_v26 = vadd.f32 %v3546_v44, %v780_v25  ;;  %v2887_v27 = vpop.f32.mrb[14].mxu1  ;;  %v3055_v8 = vld [vmem:[#allocation2 + $0x108] ss:$16 sps:$4 sm:$0xff]   ;;  %v3082_v25 = vld [vmem:[#allocation2 + $0x1a0] ss:$16 sps:$4 sm:$0xff]  }
 0x1ff   : > { %1095 = vmatprep.mubr.bf16.mxu0 %v3255_v43  ;;  %1208 = vmatprep.mubr.bf16.mxu1 %v3255_v43  ;;  %v809_v28 = vmax.f32 %v789_v24, 0.0  ;;  %v792_v29 = vadd.f32 %v2887_v27, %v3546_v44  ;;  %v783_v30 = vpop.f32.mrb[15].mxu1  ;;  %v3079_v24 = vld [vmem:[#allocation2 + $0x188] ss:$16 sps:$4 sm:$0xff]  }
 0x200   : > { %v807_v32 = vmax.f32 %v781_v26, 0.0  ;;  %v784_v33 = vadd.f32 %v3546_v44, %v783_v30  ;;  %v3010_v44 = vld [vmem:[#allocation2 + $0x20] ss:$16 sps:$4 sm:$0xff]   ;;  %v3084_v26 = vld [vmem:[#allocation2 + $0x1a4] ss:$16 sps:$4 sm:$0xff]  }
 0x201   : > { %v810_v34 = vmax.f32 %v792_v29, 0.0  ;;  %2307 = vmatpush1.bf16.msra.mxu0 %v3010_v44  ;;  %v3085_v27 = vld [vmem:[#allocation2 + $0x1a8] ss:$16 sps:$4 sm:$0xff]   ;;  %v3090_v29 = vld [vmem:[#allocation2 + $0x1c4] ss:$16 sps:$4 sm:$0xff]  }
 0x202   : > { %v808_v35 = vmax.f32 %v784_v33, 0.0  ;;  %2308 = vmatprep.subr.bf16.mxu0 %v3018_v46  ;;  %v3093_v30 = vld [vmem:[#allocation2 + $0x1cc] ss:$16 sps:$4 sm:$0xff]   ;;  %v3091_v33 = vld [vmem:[#allocation2 + $0x1c8] ss:$16 sps:$4 sm:$0xff]   ;;  %v3594_v46 = vsub.s32 3, %v3579_v40 }
 0x203   : > { %v818_v36 = vpack.c.bf16 %v810_v34, %v809_v28  ;;  %v3087_v28 = vld [vmem:[#allocation2 + $0x1ac] ss:$16 sps:$4 sm:$0xff]   ;;  %v3096_v34 = vld [vmem:[#allocation2 + $0x1e4] ss:$16 sps:$4 sm:$0xff]   ;;  %v851_v44 = vld [vmem:[%s3733_s6] sm:$0xf] }
 0x204   : > { %v817_v31 = vpack.c.bf16 %v808_v35, %v807_v32  ;;  %v3088_v32 = vld [vmem:[#allocation2 + $0x1c0] ss:$16 sps:$4 sm:$0xff]   ;;  %v3099_v35 = vld [vmem:[#allocation2 + $0x1ec] ss:$16 sps:$4 sm:$0xff]  }
 0x205   : > { %2309 = vmatpush1.bf16.msra.mxu0 %v3016_v47  ;;  %v3600_v47 = vrot.slane %v851_v44, %v3585_v42 }
 0x206   : > { %1096 = vmatmul.mubr.bf16.gmra.mrb[28].mxu0 %v814_v7  ;;  %1209 = vmatmul.mubr.bf16.gmra.mrb[28].mxu1 %v814_v7  ;;  %v3052_v7 = vld [vmem:[#allocation2 + $0x100] ss:$16 sps:$4 sm:$0xff]  }
 0x207   : > { %1105 = vmatprep.mubr.bf16.mxu0 %v3255_v43  ;;  %1218 = vmatprep.mubr.bf16.mxu1 %v3255_v43 }
 0x208   : > { %2310 = vmatprep.subr.bf16.mxu0 %v3024_v49  ;;  %v3606_v49 = vrot.slane %v851_v44, %v3594_v46 }
 0x209   : > { %2311 = vmatpush1.bf16.msra.mxu0 %v3022_v51 }
 0x20a   : > { %2312 = vmatprep.subr.bf16.mxu0 %v3030_v53 }
 0x20d   : > { %2313 = vmatpush1.bf16.msra.mxu0 %v3028_v55 }
 0x20e   : > { %1106 = vmatmul.mubr.bf16.gmra.mrb[32].mxu0 %v815_v22  ;;  %1219 = vmatmul.mubr.bf16.gmra.mrb[32].mxu1 %v815_v22  ;;  %v3081_v22 = vld [vmem:[#allocation2 + $0x18c] ss:$16 sps:$4 sm:$0xff]  }
 0x20f   : > { %1115 = vmatprep.mubr.bf16.mxu0 %v3255_v43  ;;  %1228 = vmatprep.mubr.bf16.mxu1 %v3255_v43 }
 0x210   : > { %2314 = vmatprep.subr.bf16.mxu0 %v3036_v57 }
 0x211   : > { %2315 = vmatpush1.bf16.msra.mxu0 %v3034_v59 }
 0x212   : > { %2316 = vmatprep.subr.bf16.mxu0 %v3042_v61 }
 0x215   : > { %2317 = vmatpush1.bf16.msra.mxu0 %v3040_v63 }
 0x216   : > { %1116 = vmatmul.mubr.bf16.gmra.mrb[36].mxu0 %v816_v21  ;;  %1229 = vmatmul.mubr.bf16.gmra.mrb[36].mxu1 %v816_v21  ;;  %v3078_v21 = vld [vmem:[#allocation2 + $0x184] ss:$16 sps:$4 sm:$0xff]  }
 0x217   : > { %1125 = vmatprep.mubr.bf16.mxu0 %v3255_v43  ;;  %1238 = vmatprep.mubr.bf16.mxu1 %v3255_v43 }
 0x218   : > { %2318 = vmatprep.subr.bf16.mxu0 %v3048_v1 }
 0x219   : > { %2319 = vmatpush1.bf16.msra.mxu0 %v3046_v3 }
 0x21a   : > { %2320 = vmatprep.subr.bf16.mxu0 %v3054_v5 }
 0x21d   : > { %2321 = vmatpush1.bf16.msra.mxu0 %v3052_v7 }
 0x21e   : > { %1126 = vmatmul.mubr.bf16.gmra.mrb[40].mxu0 %v817_v31  ;;  %1239 = vmatmul.mubr.bf16.gmra.mrb[40].mxu1 %v817_v31  ;;  %v3097_v31 = vld [vmem:[#allocation2 + $0x1e8] ss:$16 sps:$4 sm:$0xff]  }
 0x21f   : > { %1135 = vmatprep.mubr.bf16.mxu0 %v3255_v43  ;;  %1248 = vmatprep.mubr.bf16.mxu1 %v3255_v43  ;;  %v3021_v43 = vld [vmem:[#allocation2 + $0x4c] ss:$16 sps:$4 sm:$0xff]  }
 0x220   : > { %2390 = vmatprep.subr.bf16.mxu1 %v3021_v43  ;;  %2322 = vmatprep.subr.bf16.mxu0 %v3060_v9  ;;  %v3597_v43 = vrot.slane %v851_v44, %v3582_v41 }
 0x221   : > { %2391 = vmatpush1.bf16.msra.mxu1 %v3019_v48  ;;  %2323 = vmatpush1.bf16.msra.mxu0 %v3058_v11  ;;  %v3603_v48 = vrot.slane %v851_v44, %v3591_v45 }
 0x222   : > { %2392 = vmatprep.subr.bf16.mxu1 %v3027_v50  ;;  %2324 = vmatprep.subr.bf16.mxu0 %v3066_v13 }
 0x225   : > { %2393 = vmatpush1.bf16.msra.mxu1 %v3025_v52  ;;  %2325 = vmatpush1.bf16.msra.mxu0 %v3064_v15 }
 0x226   : > { %1136 = vmatmul.mubr.bf16.gmra.mrb[44].mxu0 %v818_v36  ;;  %1249 = vmatmul.mubr.bf16.gmra.mrb[44].mxu1 %v818_v36  ;;  %v3094_v36 = vld [vmem:[#allocation2 + $0x1e0] ss:$16 sps:$4 sm:$0xff]  }
 0x227   : > { %2394 = vmatprep.subr.bf16.mxu1 %v3033_v54  ;;  %2326 = vmatprep.subr.bf16.mxu0 %v3072_v17 }
 0x229   : > { %2395 = vmatpush1.bf16.msra.mxu1 %v3031_v56  ;;  %2327 = vmatpush1.bf16.msra.mxu0 %v3070_v19 }
 0x22a   : > { %2396 = vmatprep.subr.bf16.mxu1 %v3039_v58  ;;  %2328 = vmatprep.subr.bf16.mxu0 %v3078_v21 }
 0x22d   : > { %2397 = vmatpush1.bf16.msra.mxu1 %v3037_v60  ;;  %2329 = vmatpush1.bf16.msra.mxu0 %v3076_v23 }
 0x22e   : > { %2398 = vmatprep.subr.bf16.mxu1 %v3045_v62  ;;  %2330 = vmatprep.subr.bf16.mxu0 %v3084_v26 }
 0x231   : > { %2399 = vmatpush1.bf16.msra.mxu1 %v3043_v0  ;;  %2331 = vmatpush1.bf16.msra.mxu0 %v3082_v25 }
 0x232   : > { %2400 = vmatprep.subr.bf16.mxu1 %v3051_v2  ;;  %2332 = vmatprep.subr.bf16.mxu0 %v3090_v29 }
 0x235   : > { %2401 = vmatpush1.bf16.msra.mxu1 %v3049_v4  ;;  %2333 = vmatpush1.bf16.msra.mxu0 %v3088_v32 }
 0x236   : > { %2402 = vmatprep.subr.bf16.mxu1 %v3057_v6  ;;  %2334 = vmatprep.subr.bf16.mxu0 %v3096_v34 }
 0x239   : > { %2403 = vmatpush1.bf16.msra.mxu1 %v3055_v8  ;;  %2335 = vmatpush1.bf16.msra.mxu0 %v3094_v36 }
 0x23a   : > { %2404 = vmatprep.subr.bf16.mxu1 %v3063_v10  ;;  %2345 = vmatprep.subr.bf16.mxu0 %v3102_v37 }
 0x23d   : > { %2405 = vmatpush1.bf16.msra.mxu1 %v3061_v12 }
 0x23e   : > { %2406 = vmatprep.subr.bf16.mxu1 %v3069_v14 }
 0x241   : > { %2407 = vmatpush1.bf16.msra.mxu1 %v3067_v16 }
 0x242   : > { %2408 = vmatprep.subr.bf16.mxu1 %v3075_v18 }
 0x245   : > { %2409 = vmatpush1.bf16.msra.mxu1 %v3073_v20 }
 0x246   : > { %2410 = vmatprep.subr.bf16.mxu1 %v3081_v22 }
 0x249   : > { %2411 = vmatpush1.bf16.msra.mxu1 %v3079_v24 }
 0x24a   : > { %2412 = vmatprep.subr.bf16.mxu1 %v3087_v28 }
 0x24d   : > { %2413 = vmatpush1.bf16.msra.mxu1 %v3085_v27 }
 0x24e   : > { %2414 = vmatprep.subr.bf16.mxu1 %v3093_v30 }
 0x251   : > { %2415 = vmatpush1.bf16.msra.mxu1 %v3091_v33 }
 0x252   : > { %2416 = vmatprep.subr.bf16.mxu1 %v3099_v35 }
 0x255   : > { %2417 = vmatpush1.bf16.msra.mxu1 %v3097_v31 }
 0x256   : > { %2427 = vmatprep.subr.bf16.mxu1 %v3105_v38 }
 0x2c1   : > { %v1067_v50 = vpop.f32.mrb[16].mxu0  ;;  %v1180_v51 = vpop.f32.mrb[16].mxu1 }
 0x2c2   : > { %v1068_v52 = vadd.f32 %v1067_v50, %v3597_v43  ;;  %v1181_v53 = vadd.f32 %v1180_v51, %v3600_v47  ;;  %v1069_v54 = vpop.f32.mrb[17].mxu0  ;;  %v1182_v55 = vpop.f32.mrb[17].mxu1 }
 0x2c3   : > { %v1070_v56 = vadd.f32 %v1069_v54, %v3603_v48  ;;  %v1183_v57 = vadd.f32 %v1182_v55, %v3606_v49  ;;  %v1071_v58 = vpop.f32.mrb[18].mxu0  ;;  %v1184_v59 = vpop.f32.mrb[18].mxu1 }
 0x2c4   : > { %v1072_v60 = vadd.f32 %v1071_v58, %v3597_v43  ;;  %v1185_v61 = vadd.f32 %v1184_v59, %v3600_v47  ;;  %v1073_v62 = vpop.f32.mrb[19].mxu0  ;;  %v1186_v63 = vpop.f32.mrb[19].mxu1  ;;  %v1259_v2 = vmax.f32 %v1068_v52, 0.0  ;;  %v1261_v3 = vmax.f32 %v1181_v53, 0.0 }
 0x2c5   : > { %v1074_v0 = vadd.f32 %v1073_v62, %v3603_v48  ;;  %v1187_v1 = vadd.f32 %v1186_v63, %v3606_v49  ;;  %v1260_v6 = vmax.f32 %v1070_v56, 0.0  ;;  %v1262_v7 = vmax.f32 %v1183_v57, 0.0 }
 0x2c6   : > { %v1263_v4 = vmax.f32 %v1072_v60, 0.0  ;;  %v1265_v5 = vmax.f32 %v1185_v61, 0.0 }
 0x2c7   : > { %v1264_v8 = vmax.f32 %v1074_v0, 0.0  ;;  %v1266_v9 = vmax.f32 %v1187_v1, 0.0 }
 0x2c8   : > { %v1323_v10 = vmax.f32 %v1259_v2, %v1263_v4  ;;  %v1365_v11 = vmax.f32 %v1261_v3, %v1265_v5 }
 0x2c9   : > { %v1344_v12 = vmax.f32 %v1260_v6, %v1264_v8  ;;  %v1386_v13 = vmax.f32 %v1262_v7, %v1266_v9  ;;  %v1077_v14 = vpop.f32.mrb[20].mxu0  ;;  %v1190_v15 = vpop.f32.mrb[20].mxu1 }
 0x2ca   : > { %v1078_v16 = vadd.f32 %v1077_v14, %v3597_v43  ;;  %v1191_v17 = vadd.f32 %v1190_v15, %v3600_v47  ;;  %v1079_v18 = vpop.f32.mrb[21].mxu0  ;;  %v1192_v19 = vpop.f32.mrb[21].mxu1 }
 0x2cb   : > { %v1080_v20 = vadd.f32 %v1079_v18, %v3603_v48  ;;  %v1193_v21 = vadd.f32 %v1192_v19, %v3606_v49  ;;  %v1081_v22 = vpop.f32.mrb[22].mxu0  ;;  %v1194_v23 = vpop.f32.mrb[22].mxu1 }
 0x2cc   : > { %v1267_v24 = vmax.f32 %v1078_v16, 0.0  ;;  %v1269_v25 = vmax.f32 %v1191_v17, 0.0  ;;  %v1082_v26 = vadd.f32 %v1081_v22, %v3597_v43  ;;  %v1195_v27 = vadd.f32 %v1194_v23, %v3600_v47  ;;  %v1083_v28 = vpop.f32.mrb[23].mxu0  ;;  %v1196_v29 = vpop.f32.mrb[23].mxu1 }
 0x2cd   : > { %v1268_v30 = vmax.f32 %v1080_v20, 0.0  ;;  %v1270_v32 = vmax.f32 %v1193_v21, 0.0  ;;  %v1084_v33 = vadd.f32 %v1083_v28, %v3603_v48  ;;  %v1197_v34 = vadd.f32 %v1196_v29, %v3606_v49 }
 0x2ce   : > { %v1324_v35 = vmax.f32 %v1323_v10, %v1267_v24  ;;  %v1366_v36 = vmax.f32 %v1365_v11, %v1269_v25  ;;  %v1271_v31 = vmax.f32 %v1082_v26, 0.0  ;;  %v1273_v37 = vmax.f32 %v1195_v27, 0.0 }
 0x2cf   : > { %v1345_v38 = vmax.f32 %v1344_v12, %v1268_v30  ;;  %v1387_v44 = vmax.f32 %v1386_v13, %v1270_v32  ;;  %v1272_v50 = vmax.f32 %v1084_v33, 0.0  ;;  %v1274_v51 = vmax.f32 %v1197_v34, 0.0 }
 0x2d0   : > { %v1325_v52 = vmax.f32 %v1324_v35, %v1271_v31  ;;  %v1367_v53 = vmax.f32 %v1366_v36, %v1273_v37 }
 0x2d1   : > { %v1346_v54 = vmax.f32 %v1345_v38, %v1272_v50  ;;  %v1388_v55 = vmax.f32 %v1387_v44, %v1274_v51  ;;  %v1087_v56 = vpop.f32.mrb[24].mxu0  ;;  %v1200_v57 = vpop.f32.mrb[24].mxu1 }
 0x2d2   : > { %v1088_v58 = vadd.f32 %v1087_v56, %v3597_v43  ;;  %v1201_v59 = vadd.f32 %v1200_v57, %v3600_v47  ;;  %v1089_v60 = vpop.f32.mrb[25].mxu0  ;;  %v1202_v61 = vpop.f32.mrb[25].mxu1 }
 0x2d3   : > { %v1090_v62 = vadd.f32 %v1089_v60, %v3603_v48  ;;  %v1203_v63 = vadd.f32 %v1202_v61, %v3606_v49  ;;  %v1091_v0 = vpop.f32.mrb[26].mxu0  ;;  %v1204_v1 = vpop.f32.mrb[26].mxu1 }
 0x2d4   : > { %v1275_v2 = vmax.f32 %v1088_v58, 0.0  ;;  %v1277_v3 = vmax.f32 %v1201_v59, 0.0  ;;  %v1092_v4 = vadd.f32 %v1091_v0, %v3597_v43  ;;  %v1205_v5 = vadd.f32 %v1204_v1, %v3600_v47  ;;  %v1093_v6 = vpop.f32.mrb[27].mxu0  ;;  %v1206_v7 = vpop.f32.mrb[27].mxu1 }
 0x2d5   : > { %v1276_v8 = vmax.f32 %v1090_v62, 0.0  ;;  %v1278_v9 = vmax.f32 %v1203_v63, 0.0  ;;  %v1094_v10 = vadd.f32 %v1093_v6, %v3603_v48  ;;  %v1207_v11 = vadd.f32 %v1206_v7, %v3606_v49 }
 0x2d6   : > { %v1326_v12 = vmax.f32 %v1325_v52, %v1275_v2  ;;  %v1368_v13 = vmax.f32 %v1367_v53, %v1277_v3  ;;  %v1279_v14 = vmax.f32 %v1092_v4, 0.0  ;;  %v1281_v15 = vmax.f32 %v1205_v5, 0.0 }
 0x2d7   : > { %v1347_v16 = vmax.f32 %v1346_v54, %v1276_v8  ;;  %v1389_v17 = vmax.f32 %v1388_v55, %v1278_v9  ;;  %v1280_v18 = vmax.f32 %v1094_v10, 0.0  ;;  %v1282_v19 = vmax.f32 %v1207_v11, 0.0 }
 0x2d8   : > { %v1327_v20 = vmax.f32 %v1326_v12, %v1279_v14  ;;  %v1369_v21 = vmax.f32 %v1368_v13, %v1281_v15 }
 0x2d9   : > { %v1348_v22 = vmax.f32 %v1347_v16, %v1280_v18  ;;  %v1390_v23 = vmax.f32 %v1389_v17, %v1282_v19  ;;  %v1097_v24 = vpop.f32.mrb[28].mxu0  ;;  %v1210_v25 = vpop.f32.mrb[28].mxu1 }
 0x2da   : > { %v1098_v26 = vadd.f32 %v1097_v24, %v3597_v43  ;;  %v1211_v27 = vadd.f32 %v1210_v25, %v3600_v47  ;;  %v1099_v28 = vpop.f32.mrb[29].mxu0  ;;  %v1212_v29 = vpop.f32.mrb[29].mxu1 }
 0x2db   : > { %v1100_v30 = vadd.f32 %v1099_v28, %v3603_v48  ;;  %v1213_v32 = vadd.f32 %v1212_v29, %v3606_v49  ;;  %v1101_v33 = vpop.f32.mrb[30].mxu0  ;;  %v1214_v34 = vpop.f32.mrb[30].mxu1 }
 0x2dc   : > { %v1283_v35 = vmax.f32 %v1098_v26, 0.0  ;;  %v1285_v36 = vmax.f32 %v1211_v27, 0.0  ;;  %v1102_v31 = vadd.f32 %v1101_v33, %v3597_v43  ;;  %v1215_v37 = vadd.f32 %v1214_v34, %v3600_v47  ;;  %v1103_v38 = vpop.f32.mrb[31].mxu0  ;;  %v1216_v44 = vpop.f32.mrb[31].mxu1 }
 0x2dd   : > { %v1284_v50 = vmax.f32 %v1100_v30, 0.0  ;;  %v1286_v51 = vmax.f32 %v1213_v32, 0.0  ;;  %v1104_v52 = vadd.f32 %v1103_v38, %v3603_v48  ;;  %v1217_v53 = vadd.f32 %v1216_v44, %v3606_v49 }
 0x2de   : > { %v1328_v54 = vmax.f32 %v1327_v20, %v1283_v35  ;;  %v1370_v55 = vmax.f32 %v1369_v21, %v1285_v36  ;;  %v1287_v56 = vmax.f32 %v1102_v31, 0.0  ;;  %v1289_v57 = vmax.f32 %v1215_v37, 0.0 }
 0x2df   : > { %v1349_v58 = vmax.f32 %v1348_v22, %v1284_v50  ;;  %v1391_v59 = vmax.f32 %v1390_v23, %v1286_v51  ;;  %v1288_v60 = vmax.f32 %v1104_v52, 0.0  ;;  %v1290_v61 = vmax.f32 %v1217_v53, 0.0 }
 0x2e0   : > { %v1329_v62 = vmax.f32 %v1328_v54, %v1287_v56  ;;  %v1371_v63 = vmax.f32 %v1370_v55, %v1289_v57 }
 0x2e1   : > { %v1350_v0 = vmax.f32 %v1349_v58, %v1288_v60  ;;  %v1392_v1 = vmax.f32 %v1391_v59, %v1290_v61  ;;  %v1107_v2 = vpop.f32.mrb[32].mxu0  ;;  %v1220_v3 = vpop.f32.mrb[32].mxu1 }
 0x2e2   : > { %v1108_v4 = vadd.f32 %v1107_v2, %v3597_v43  ;;  %v1221_v5 = vadd.f32 %v1220_v3, %v3600_v47  ;;  %v1109_v6 = vpop.f32.mrb[33].mxu0  ;;  %v1222_v7 = vpop.f32.mrb[33].mxu1 }
 0x2e3   : > { %v1110_v8 = vadd.f32 %v1109_v6, %v3603_v48  ;;  %v1223_v9 = vadd.f32 %v1222_v7, %v3606_v49  ;;  %v1111_v10 = vpop.f32.mrb[34].mxu0  ;;  %v1224_v11 = vpop.f32.mrb[34].mxu1 }
 0x2e4   : > { %v1291_v12 = vmax.f32 %v1108_v4, 0.0  ;;  %v1293_v13 = vmax.f32 %v1221_v5, 0.0  ;;  %v1112_v14 = vadd.f32 %v1111_v10, %v3597_v43  ;;  %v1225_v15 = vadd.f32 %v1224_v11, %v3600_v47  ;;  %v1113_v16 = vpop.f32.mrb[35].mxu0  ;;  %v1226_v17 = vpop.f32.mrb[35].mxu1 }
 0x2e5   : > { %v1292_v18 = vmax.f32 %v1110_v8, 0.0  ;;  %v1294_v19 = vmax.f32 %v1223_v9, 0.0  ;;  %v1114_v20 = vadd.f32 %v1113_v16, %v3603_v48  ;;  %v1227_v21 = vadd.f32 %v1226_v17, %v3606_v49 }
 0x2e6   : > { %v1330_v22 = vmax.f32 %v1329_v62, %v1291_v12  ;;  %v1372_v23 = vmax.f32 %v1371_v63, %v1293_v13  ;;  %v1295_v24 = vmax.f32 %v1112_v14, 0.0  ;;  %v1297_v25 = vmax.f32 %v1225_v15, 0.0 }
 0x2e7   : > { %v1351_v26 = vmax.f32 %v1350_v0, %v1292_v18  ;;  %v1393_v27 = vmax.f32 %v1392_v1, %v1294_v19  ;;  %v1296_v28 = vmax.f32 %v1114_v20, 0.0  ;;  %v1298_v29 = vmax.f32 %v1227_v21, 0.0 }
 0x2e8   : > { %v1331_v30 = vmax.f32 %v1330_v22, %v1295_v24  ;;  %v1373_v32 = vmax.f32 %v1372_v23, %v1297_v25 }
 0x2e9   : > { %v1352_v33 = vmax.f32 %v1351_v26, %v1296_v28  ;;  %v1394_v34 = vmax.f32 %v1393_v27, %v1298_v29  ;;  %v1117_v35 = vpop.f32.mrb[36].mxu0  ;;  %v1230_v36 = vpop.f32.mrb[36].mxu1 }
 0x2ea   : > { %v1118_v31 = vadd.f32 %v1117_v35, %v3597_v43  ;;  %v1231_v37 = vadd.f32 %v1230_v36, %v3600_v47  ;;  %v1119_v38 = vpop.f32.mrb[37].mxu0  ;;  %v1232_v44 = vpop.f32.mrb[37].mxu1 }
 0x2eb   : > { %v1120_v50 = vadd.f32 %v1119_v38, %v3603_v48  ;;  %v1233_v51 = vadd.f32 %v1232_v44, %v3606_v49  ;;  %v1121_v52 = vpop.f32.mrb[38].mxu0  ;;  %v1234_v53 = vpop.f32.mrb[38].mxu1 }
 0x2ec   : > { %v1299_v54 = vmax.f32 %v1118_v31, 0.0  ;;  %v1301_v55 = vmax.f32 %v1231_v37, 0.0  ;;  %v1122_v56 = vadd.f32 %v1121_v52, %v3597_v43  ;;  %v1235_v57 = vadd.f32 %v1234_v53, %v3600_v47  ;;  %v1123_v58 = vpop.f32.mrb[39].mxu0  ;;  %v1236_v59 = vpop.f32.mrb[39].mxu1 }
 0x2ed   : > { %v1300_v60 = vmax.f32 %v1120_v50, 0.0  ;;  %v1302_v61 = vmax.f32 %v1233_v51, 0.0  ;;  %v1124_v62 = vadd.f32 %v1123_v58, %v3603_v48  ;;  %v1237_v63 = vadd.f32 %v1236_v59, %v3606_v49 }
 0x2ee   : > { %v1332_v0 = vmax.f32 %v1331_v30, %v1299_v54  ;;  %v1374_v1 = vmax.f32 %v1373_v32, %v1301_v55  ;;  %v1303_v2 = vmax.f32 %v1122_v56, 0.0  ;;  %v1305_v3 = vmax.f32 %v1235_v57, 0.0 }
 0x2ef   : > { %v1353_v4 = vmax.f32 %v1352_v33, %v1300_v60  ;;  %v1395_v5 = vmax.f32 %v1394_v34, %v1302_v61  ;;  %v1304_v6 = vmax.f32 %v1124_v62, 0.0  ;;  %v1306_v7 = vmax.f32 %v1237_v63, 0.0 }
 0x2f0   : > { %v1333_v8 = vmax.f32 %v1332_v0, %v1303_v2  ;;  %v1375_v9 = vmax.f32 %v1374_v1, %v1305_v3 }
 0x2f1   : > { %v1354_v10 = vmax.f32 %v1353_v4, %v1304_v6  ;;  %v1396_v11 = vmax.f32 %v1395_v5, %v1306_v7  ;;  %v1127_v12 = vpop.f32.mrb[40].mxu0  ;;  %v1240_v13 = vpop.f32.mrb[40].mxu1 }
 0x2f2   : > { %v1128_v14 = vadd.f32 %v1127_v12, %v3597_v43  ;;  %v1241_v15 = vadd.f32 %v1240_v13, %v3600_v47  ;;  %v1129_v16 = vpop.f32.mrb[41].mxu0  ;;  %v1242_v17 = vpop.f32.mrb[41].mxu1 }
 0x2f3   : > { %v1130_v18 = vadd.f32 %v1129_v16, %v3603_v48  ;;  %v1243_v19 = vadd.f32 %v1242_v17, %v3606_v49  ;;  %v1131_v20 = vpop.f32.mrb[42].mxu0  ;;  %v1244_v21 = vpop.f32.mrb[42].mxu1 }
 0x2f4   : > { %v1307_v22 = vmax.f32 %v1128_v14, 0.0  ;;  %v1309_v23 = vmax.f32 %v1241_v15, 0.0  ;;  %v1132_v24 = vadd.f32 %v1131_v20, %v3597_v43  ;;  %v1245_v25 = vadd.f32 %v1244_v21, %v3600_v47  ;;  %v1133_v26 = vpop.f32.mrb[43].mxu0  ;;  %v1246_v27 = vpop.f32.mrb[43].mxu1 }
 0x2f5   : > { %v1308_v28 = vmax.f32 %v1130_v18, 0.0  ;;  %v1310_v29 = vmax.f32 %v1243_v19, 0.0  ;;  %v1134_v30 = vadd.f32 %v1133_v26, %v3603_v48  ;;  %v1247_v32 = vadd.f32 %v1246_v27, %v3606_v49 }
 0x2f6   : > { %v1334_v33 = vmax.f32 %v1333_v8, %v1307_v22  ;;  %v1376_v34 = vmax.f32 %v1375_v9, %v1309_v23  ;;  %v1311_v35 = vmax.f32 %v1132_v24, 0.0  ;;  %v1313_v36 = vmax.f32 %v1245_v25, 0.0 }
 0x2f7   : > { %v1355_v31 = vmax.f32 %v1354_v10, %v1308_v28  ;;  %v1397_v37 = vmax.f32 %v1396_v11, %v1310_v29  ;;  %v1312_v38 = vmax.f32 %v1134_v30, 0.0  ;;  %v1314_v44 = vmax.f32 %v1247_v32, 0.0 }
 0x2f8   : > { %v1335_v50 = vmax.f32 %v1334_v33, %v1311_v35  ;;  %v1377_v51 = vmax.f32 %v1376_v34, %v1313_v36 }
 0x2f9   : > { %v1356_v52 = vmax.f32 %v1355_v31, %v1312_v38  ;;  %v1398_v53 = vmax.f32 %v1397_v37, %v1314_v44  ;;  %v1137_v54 = vpop.f32.mrb[44].mxu0  ;;  %v1250_v55 = vpop.f32.mrb[44].mxu1 }
 0x2fa   : > { %v1138_v56 = vadd.f32 %v1137_v54, %v3597_v43  ;;  %v1251_v57 = vadd.f32 %v1250_v55, %v3600_v47  ;;  %v1139_v58 = vpop.f32.mrb[45].mxu0  ;;  %v1252_v59 = vpop.f32.mrb[45].mxu1 }
 0x2fb   : > { %v1140_v60 = vadd.f32 %v1139_v58, %v3603_v48  ;;  %v1253_v61 = vadd.f32 %v1252_v59, %v3606_v49  ;;  %v1141_v62 = vpop.f32.mrb[46].mxu0  ;;  %v1254_v63 = vpop.f32.mrb[46].mxu1 }
 0x2fc   : > { %v1315_v0 = vmax.f32 %v1138_v56, 0.0  ;;  %v1317_v1 = vmax.f32 %v1251_v57, 0.0  ;;  %v1142_v2 = vadd.f32 %v1141_v62, %v3597_v43  ;;  %v1255_v3 = vadd.f32 %v1254_v63, %v3600_v47  ;;  %v1143_v4 = vpop.f32.mrb[47].mxu0  ;;  %v1256_v5 = vpop.f32.mrb[47].mxu1 }
 0x2fd   : > { %v1316_v6 = vmax.f32 %v1140_v60, 0.0  ;;  %v1318_v7 = vmax.f32 %v1253_v61, 0.0  ;;  %v1144_v8 = vadd.f32 %v1143_v4, %v3603_v48  ;;  %v1257_v9 = vadd.f32 %v1256_v5, %v3606_v49  ;;  %v3108_v5 = vld [vmem:[#allocation2 + $0x224] ss:$16 sps:$4 sm:$0xff]  }
 0x2fe   : > { %v1336_v10 = vmax.f32 %v1335_v50, %v1315_v0  ;;  %v1378_v11 = vmax.f32 %v1377_v51, %v1317_v1  ;;  %v1319_v12 = vmax.f32 %v1142_v2, 0.0  ;;  %v1321_v13 = vmax.f32 %v1255_v3, 0.0  ;;  %v3100_v2 = vld [vmem:[#allocation2 + $0x200] ss:$16 sps:$4 sm:$0xff]   ;;  %v3103_v3 = vld [vmem:[#allocation2 + $0x208] ss:$16 sps:$4 sm:$0xff]  }
 0x2ff   : > { %v1357_v14 = vmax.f32 %v1356_v52, %v1316_v6  ;;  %v1399_v15 = vmax.f32 %v1398_v53, %v1318_v7  ;;  %v1320_v16 = vmax.f32 %v1144_v8, 0.0  ;;  %v1322_v17 = vmax.f32 %v1257_v9, 0.0  ;;  %v3111_v6 = vld [vmem:[#allocation2 + $0x22c] ss:$16 sps:$4 sm:$0xff]   ;;  %v3106_v8 = vld [vmem:[#allocation2 + $0x220] ss:$16 sps:$4 sm:$0xff]  }
 0x300   : > { %v1337_v18 = vmax.f32 %v1336_v10, %v1319_v12  ;;  %v1379_v43 = vmax.f32 %v1378_v11, %v1321_v13  ;;  %v3256_v49 = vmov 1966171168   ;;  %v3109_v9 = vld [vmem:[#allocation2 + $0x228] ss:$16 sps:$4 sm:$0xff]   ;;  %v3114_v10 = vld [vmem:[#allocation2 + $0x244] ss:$16 sps:$4 sm:$0xff]  }
 0x301   : > { %v1358_v19 = vmax.f32 %v1357_v14, %v1320_v16  ;;  %v1400_v47 = vmax.f32 %v1399_v15, %v1322_v17  ;;  %v1418_v26 = vunpack.c.l.s4 %v3256_v49  ;;  %v3117_v11 = vld [vmem:[#allocation2 + $0x24c] ss:$16 sps:$4 sm:$0xff]   ;;  %v3112_v12 = vld [vmem:[#allocation2 + $0x240] ss:$16 sps:$4 sm:$0xff]   ;;  %v3115_v13 = vld [vmem:[#allocation2 + $0x248] ss:$16 sps:$4 sm:$0xff]  }
 0x302   : > { %v1338_v20 = vrot.slane %v1337_v18, 4  ;;  %v1380_v21 = vrot.slane %v1379_v43, 4  ;;  %v3120_v14 = vld [vmem:[#allocation2 + $0x264] ss:$16 sps:$4 sm:$0xff]   ;;  %v3123_v15 = vld [vmem:[#allocation2 + $0x26c] ss:$16 sps:$4 sm:$0xff]  }
 0x303   : > { %v1359_v22 = vrot.slane %v1358_v19, 4  ;;  %v1401_v23 = vrot.slane %v1400_v47, 4  ;;  %v1419_v36 = vunpack.c.0.s8 %v1418_v26  ;;  %v3118_v16 = vld [vmem:[#allocation2 + $0x260] ss:$16 sps:$4 sm:$0xff]   ;;  %v3121_v17 = vld [vmem:[#allocation2 + $0x268] ss:$16 sps:$4 sm:$0xff]  }
 0x304   : > { %v1339_v24 = vmax.f32 %v1337_v18, %v1338_v20  ;;  %v1381_v48 = vmax.f32 %v1379_v43, %v1380_v21  ;;  %v3126_v18 = vld [vmem:[#allocation2 + $0x284] ss:$16 sps:$4 sm:$0xff]   ;;  %v3129_v43 = vld [vmem:[#allocation2 + $0x28c] ss:$16 sps:$4 sm:$0xff]   ;;  %v3139_v49 = vld [vmem:[#allocation2 + $0x2c8] ss:$16 sps:$4 sm:$0xff]  }
 0x305   : > { %v1360_v25 = vmax.f32 %v1358_v19, %v1359_v22  ;;  %v1402_v27 = vmax.f32 %v1400_v47, %v1401_v23  ;;  %v3673_v54 = vsub.s32 %v1419_v36, %v3579_v40  ;;  %v3124_v19 = vld [vmem:[#allocation2 + $0x280] ss:$16 sps:$4 sm:$0xff]   ;;  %v3127_v47 = vld [vmem:[#allocation2 + $0x288] ss:$16 sps:$4 sm:$0xff]   ;;  %v3132_v20 = vld [vmem:[#allocation2 + $0x2a4] ss:$16 sps:$4 sm:$0xff]  }
 0x306   : > { %v1340_v28 = vrot.slane %v1339_v24, 2  ;;  %v1382_v29 = vrot.slane %v1381_v48, 2  ;;  %v3135_v21 = vld [vmem:[#allocation2 + $0x2ac] ss:$16 sps:$4 sm:$0xff]   ;;  %v3130_v22 = vld [vmem:[#allocation2 + $0x2a0] ss:$16 sps:$4 sm:$0xff]  }
 0x307   : > { %v1361_v30 = vrot.slane %v1360_v25, 2  ;;  %v1403_v32 = vrot.slane %v1402_v27, 2  ;;  %v3133_v23 = vld [vmem:[#allocation2 + $0x2a8] ss:$16 sps:$4 sm:$0xff]   ;;  %v3144_v26 = vld [vmem:[#allocation2 + $0x2e4] ss:$16 sps:$4 sm:$0xff]  }
 0x308   : > { %v1341_v33 = vmax.f32 %v1339_v24, %v1340_v28  ;;  %v1383_v34 = vmax.f32 %v1381_v48, %v1382_v29  ;;  %v3138_v24 = vld [vmem:[#allocation2 + $0x2c4] ss:$16 sps:$4 sm:$0xff]   ;;  %v3141_v48 = vld [vmem:[#allocation2 + $0x2cc] ss:$16 sps:$4 sm:$0xff]   ;;  %v3142_v28 = vld [vmem:[#allocation2 + $0x2e0] ss:$16 sps:$4 sm:$0xff]  }
 0x309   : > { %v1362_v35 = vmax.f32 %v1360_v25, %v1361_v30  ;;  %v1404_v31 = vmax.f32 %v1402_v27, %v1403_v32  ;;  %v3136_v25 = vld [vmem:[#allocation2 + $0x2c0] ss:$16 sps:$4 sm:$0xff]   ;;  %v3147_v27 = vld [vmem:[#allocation2 + $0x2ec] ss:$16 sps:$4 sm:$0xff]   ;;  %v3145_v29 = vld [vmem:[#allocation2 + $0x2e8] ss:$16 sps:$4 sm:$0xff]  }
 0x30a   : > { %v1342_v37 = vrot.slane %v1341_v33, 1  ;;  %v1384_v38 = vrot.slane %v1383_v34, 1  ;;  %v3150_v30 = vld [vmem:[#allocation2 + $0x304] ss:$16 sps:$4 sm:$0xff]   ;;  %v3153_v32 = vld [vmem:[#allocation2 + $0x30c] ss:$16 sps:$4 sm:$0xff]  }
 0x30b   : > { %v1363_v44 = vrot.slane %v1362_v35, 1  ;;  %v1405_v50 = vrot.slane %v1404_v31, 1  ;;  %v3159_v36 = vld [vmem:[#allocation2 + $0x32c] ss:$16 sps:$4 sm:$0xff]  }
 0x30c   : > { %v1343_v51 = vmax.f32 %v1341_v33, %v1342_v37  ;;  %v1385_v52 = vmax.f32 %v1383_v34, %v1384_v38  ;;  %v3148_v33 = vld [vmem:[#allocation2 + $0x300] ss:$16 sps:$4 sm:$0xff]   ;;  %v3151_v34 = vld [vmem:[#allocation2 + $0x308] ss:$16 sps:$4 sm:$0xff]   ;;  %v3162_v38 = vld [vmem:[#allocation2 + $0x344] ss:$16 sps:$4 sm:$0xff]  }
 0x30d   : > { %v1364_v53 = vmax.f32 %v1362_v35, %v1363_v44  ;;  %v1406_v55 = vmax.f32 %v1404_v31, %v1405_v50  ;;  %v3156_v35 = vld [vmem:[#allocation2 + $0x324] ss:$16 sps:$4 sm:$0xff]   ;;  %v3154_v31 = vld [vmem:[#allocation2 + $0x320] ss:$16 sps:$4 sm:$0xff]   ;;  %v3157_v37 = vld [vmem:[#allocation2 + $0x328] ss:$16 sps:$4 sm:$0xff]  }
 0x30e   : > { %v3165_v44 = vld [vmem:[#allocation2 + $0x34c] ss:$16 sps:$4 sm:$0xff]   ;;  %v3160_v50 = vld [vmem:[#allocation2 + $0x340] ss:$16 sps:$4 sm:$0xff]  }
 0x30f   : > { %v1415_v56 = vcombine.low %v1343_v51, %v1364_v53  ;;  %v1416_v57 = vcombine.low %v1385_v52, %v1406_v55  ;;  %v3163_v51 = vld [vmem:[#allocation2 + $0x348] ss:$16 sps:$4 sm:$0xff]   ;;  %v3168_v52 = vld [vmem:[#allocation2 + $0x364] ss:$16 sps:$4 sm:$0xff]   ;;  %v3171_v53 = vld [vmem:[#allocation2 + $0x36c] ss:$16 sps:$4 sm:$0xff]  }
 0x310   : > { %v3166_v55 = vld [vmem:[#allocation2 + $0x360] ss:$16 sps:$4 sm:$0xff]  }
 0x311   : > { %v1423_v58 = vrot.slane %v1415_v56, %v3673_v54  ;;  %v1430_v59 = vrot.slane %v1416_v57, %v3673_v54  ;;  %v3169_v56 = vld [vmem:[#allocation2 + $0x368] ss:$16 sps:$4 sm:$0xff]   ;;  %v3174_v57 = vld [vmem:[#allocation2 + $0x384] ss:$16 sps:$4 sm:$0xff]  }
 0x313   : > { %v1431_v60 = vcombine.low %v1423_v58, %v1430_v59  ;;  %v3177_v58 = vld [vmem:[#allocation2 + $0x38c] ss:$16 sps:$4 sm:$0xff]   ;;  %v3172_v59 = vld [vmem:[#allocation2 + $0x380] ss:$16 sps:$4 sm:$0xff]  }
 0x315   : > { %v1438_v40 = vrot.slane %v1431_v60, %v3673_v54  ;;  %v3175_v60 = vld [vmem:[#allocation2 + $0x388] ss:$16 sps:$4 sm:$0xff]  }
 0x317   : > { %1444 = vst.msk [vmem:[%s407_s20] sm:$0xf] %vm3684_vm2, %v1438_v40  ;;  %v3180_v40 = vld [vmem:[#allocation2 + $0x3a4] ss:$16 sps:$4 sm:$0xff]  }
 0x31e   : > { %v3691_v62 = vld [vmem:[%s407_s20] sm:$0xf] }
 0x31f   : > { %v1497_v63 = vrot.slane %v3691_v62, %v3591_v45  ;;  %v1493_v0 = vrot.slane %v3691_v62, %v3582_v41  ;;  %v1505_v1 = vrot.slane %v3691_v62, %v3594_v46 }
 0x321   : > { %v1511_v39 = vpack.c.bf16 %v1497_v63, %v1497_v63  ;;  %v1510_v4 = vpack.c.bf16 %v1493_v0, %v1493_v0  ;;  %v1513_v7 = vpack.c.bf16 %v1505_v1, %v1505_v1  ;;  %v3183_v63 = vld [vmem:[#allocation2 + $0x3ac] ss:$16 sps:$4 sm:$0xff]   ;;  %v3178_v0 = vld [vmem:[#allocation2 + $0x3a0] ss:$16 sps:$4 sm:$0xff]   ;;  %v3181_v1 = vld [vmem:[#allocation2 + $0x3a8] ss:$16 sps:$4 sm:$0xff]  }
 0x323   : > { %2336 = vmatprep.mubr.bf16.mxu0 %v1511_v39  ;;  %2418 = vmatprep.mubr.bf16.mxu1 %v1511_v39  ;;  %v3186_v39 = vld [vmem:[#allocation2 + $0x3c4] ss:$16 sps:$4 sm:$0xff]  }
 0x324   : > { %2337 = vmatmul.mubr.bf16.vlgmr.msra.gmra.mrb[48].mxu0 %v1510_v4  ;;  %2419 = vmatmul.mubr.bf16.vlgmr.msra.gmra.mrb[48].mxu1 %v1510_v4  ;;  %v3187_v4 = vld [vmem:[#allocation2 + $0x3c8] ss:$16 sps:$4 sm:$0xff]  }
 0x325   : > { %2346 = vmatpush1.bf16.msra.mxu0 %v3100_v2  ;;  %2428 = vmatpush1.bf16.msra.mxu1 %v3103_v3  ;;  %v3189_v2 = vld [vmem:[#allocation2 + $0x3cc] ss:$16 sps:$4 sm:$0xff]   ;;  %v3184_v3 = vld [vmem:[#allocation2 + $0x3c0] ss:$16 sps:$4 sm:$0xff]  }
 0x326   : > { %2377 = vmatprep.mubr.bf16.mxu0 %v1513_v7  ;;  %2459 = vmatprep.mubr.bf16.mxu1 %v1513_v7  ;;  %v3190_v7 = vld [vmem:[#allocation2 + $0x3e0] ss:$16 sps:$4 sm:$0xff]  }
 0x327   : > { %2347 = vmatprep.subr.bf16.mxu0 %v3108_v5  ;;  %2429 = vmatprep.subr.bf16.mxu1 %v3111_v6  ;;  %v3192_v5 = vld [vmem:[#allocation2 + $0x3e4] ss:$16 sps:$4 sm:$0xff]   ;;  %v3195_v6 = vld [vmem:[#allocation2 + $0x3ec] ss:$16 sps:$4 sm:$0xff]  }
 0x329   : > { %2348 = vmatpush1.bf16.msra.mxu0 %v3106_v8  ;;  %2430 = vmatpush1.bf16.msra.mxu1 %v3109_v9  ;;  %v3193_v8 = vld [vmem:[#allocation2 + $0x3e8] ss:$16 sps:$4 sm:$0xff]   ;;  %v1501_v9 = vrot.slane %v3691_v62, %v3585_v42 }
 0x32a   : > { %2349 = vmatprep.subr.bf16.mxu0 %v3114_v10  ;;  %2431 = vmatprep.subr.bf16.mxu1 %v3117_v11  ;;  %v1642_v11 = vld [vmem:[%s3735_s8] sm:$0xf] }
 0x32b   : > { %v1512_v10 = vpack.c.bf16 %v1501_v9, %v1501_v9 }
 0x32d   : > { %2350 = vmatpush1.bf16.msra.mxu0 %v3112_v12  ;;  %2432 = vmatpush1.bf16.msra.mxu1 %v3115_v13  ;;  %v2287_v12 = vrot.slane %v1642_v11, %v3582_v41  ;;  %v2295_v13 = vrot.slane %v1642_v11, %v3585_v42 }
 0x32e   : > { %2351 = vmatprep.subr.bf16.mxu0 %v3120_v14  ;;  %2433 = vmatprep.subr.bf16.mxu1 %v3123_v15  ;;  %v2291_v14 = vrot.slane %v1642_v11, %v3591_v45  ;;  %v2299_v15 = vrot.slane %v1642_v11, %v3594_v46 }
 0x331   : > { %2352 = vmatpush1.bf16.msra.mxu0 %v3118_v16  ;;  %2434 = vmatpush1.bf16.msra.mxu1 %v3121_v17 }
 0x332   : > { %2353 = vmatprep.subr.bf16.mxu0 %v3126_v18  ;;  %2435 = vmatprep.subr.bf16.mxu1 %v3129_v43 }
 0x335   : > { %2354 = vmatpush1.bf16.msra.mxu0 %v3124_v19  ;;  %2436 = vmatpush1.bf16.msra.mxu1 %v3127_v47 }
 0x336   : > { %2355 = vmatprep.subr.bf16.mxu0 %v3132_v20  ;;  %2437 = vmatprep.subr.bf16.mxu1 %v3135_v21 }
 0x339   : > { %2356 = vmatpush1.bf16.msra.mxu0 %v3130_v22  ;;  %2438 = vmatpush1.bf16.msra.mxu1 %v3133_v23 }
 0x33a   : > { %2357 = vmatprep.subr.bf16.mxu0 %v3138_v24  ;;  %2439 = vmatprep.subr.bf16.mxu1 %v3141_v48 }
 0x33d   : > { %2358 = vmatpush1.bf16.msra.mxu0 %v3136_v25  ;;  %2440 = vmatpush1.bf16.msra.mxu1 %v3139_v49 }
 0x33e   : > { %2359 = vmatprep.subr.bf16.mxu0 %v3144_v26  ;;  %2441 = vmatprep.subr.bf16.mxu1 %v3147_v27 }
 0x341   : > { %2360 = vmatpush1.bf16.msra.mxu0 %v3142_v28  ;;  %2442 = vmatpush1.bf16.msra.mxu1 %v3145_v29 }
 0x342   : > { %2361 = vmatprep.subr.bf16.mxu0 %v3150_v30  ;;  %2443 = vmatprep.subr.bf16.mxu1 %v3153_v32 }
 0x345   : > { %2362 = vmatpush1.bf16.msra.mxu0 %v3148_v33  ;;  %2444 = vmatpush1.bf16.msra.mxu1 %v3151_v34 }
 0x346   : > { %2363 = vmatprep.subr.bf16.mxu0 %v3156_v35  ;;  %2445 = vmatprep.subr.bf16.mxu1 %v3159_v36 }
 0x349   : > { %2364 = vmatpush1.bf16.msra.mxu0 %v3154_v31  ;;  %2446 = vmatpush1.bf16.msra.mxu1 %v3157_v37 }
 0x34a   : > { %2365 = vmatprep.subr.bf16.mxu0 %v3162_v38  ;;  %2447 = vmatprep.subr.bf16.mxu1 %v3165_v44 }
 0x34d   : > { %2366 = vmatpush1.bf16.msra.mxu0 %v3160_v50  ;;  %2448 = vmatpush1.bf16.msra.mxu1 %v3163_v51 }
 0x34e   : > { %2367 = vmatprep.subr.bf16.mxu0 %v3168_v52  ;;  %2449 = vmatprep.subr.bf16.mxu1 %v3171_v53 }
 0x351   : > { %2368 = vmatpush1.bf16.msra.mxu0 %v3166_v55  ;;  %2450 = vmatpush1.bf16.msra.mxu1 %v3169_v56 }
 0x352   : > { %2369 = vmatprep.subr.bf16.mxu0 %v3174_v57  ;;  %2451 = vmatprep.subr.bf16.mxu1 %v3177_v58 }
 0x355   : > { %2370 = vmatpush1.bf16.msra.mxu0 %v3172_v59  ;;  %2452 = vmatpush1.bf16.msra.mxu1 %v3175_v60 }
 0x356   : > { %2371 = vmatprep.subr.bf16.mxu0 %v3180_v40  ;;  %2453 = vmatprep.subr.bf16.mxu1 %v3183_v63 }
 0x359   : > { %2372 = vmatpush1.bf16.msra.mxu0 %v3178_v0  ;;  %2454 = vmatpush1.bf16.msra.mxu1 %v3181_v1 }
 0x35a   : > { %2373 = vmatprep.subr.bf16.mxu0 %v3186_v39  ;;  %2455 = vmatprep.subr.bf16.mxu1 %v3189_v2 }
 0x35d   : > { %2374 = vmatpush1.bf16.msra.mxu0 %v3184_v3  ;;  %2456 = vmatpush1.bf16.msra.mxu1 %v3187_v4 }
 0x35e   : > { %2375 = vmatprep.subr.bf16.mxu0 %v3192_v5  ;;  %2457 = vmatprep.subr.bf16.mxu1 %v3195_v6 }
 0x361   : > { %2376 = vmatpush1.bf16.msra.mxu0 %v3190_v7  ;;  %2458 = vmatpush1.bf16.msra.mxu1 %v3193_v8 }
 0x364   : > { %2378 = vmatmul.mubr.bf16.vlgmr.msra.gmra.mrb[48].mxu0 %v1512_v10  ;;  %2460 = vmatmul.mubr.bf16.vlgmr.msra.gmra.mrb[48].mxu1 %v1512_v10 }
 0x437   : > { %v2379_v16 = vpop.f32.mrb[48].mxu0  ;;  %v2461_v17 = vpop.f32.mrb[48].mxu1 }
 0x438   : > { %v2888_v62 = vadd.f32 %v2379_v16, %v2287_v12  ;;  %v2890_v18 = vadd.f32 %v2461_v17, %v2295_v13  ;;  %v2381_v43 = vpop.f32.mrb[49].mxu0  ;;  %v2463_v19 = vpop.f32.mrb[49].mxu1 }
 0x439   : > { %v2889_v47 = vadd.f32 %v2381_v43, %v2291_v14  ;;  %v2891_v20 = vadd.f32 %v2463_v19, %v2299_v15  ;;  %v2383_v21 = vpop.f32.mrb[50].mxu0  ;;  %v2465_v22 = vpop.f32.mrb[50].mxu1 }
 0x43a   : > { %v2384_v23 = vpop.f32.mrb[51].mxu0  ;;  %v2466_v24 = vpop.f32.mrb[51].mxu1 }
 0x43b   : > { %v2472_v41 = vcombine.low %v2888_v62, %v2889_v47  ;;  %v2473_v48 = vcombine.low %v2890_v18, %v2891_v20 }
 0x43d   : > { %v2480_v42 = vrot.slane %v2472_v41, %v3673_v54  ;;  %v2487_v45 = vrot.slane %v2473_v48, %v3673_v54 }
 0x43f   : > { %v2488_v46 = vcombine.low %v2480_v42, %v2487_v45 }
 0x441   : > { %v2495_v25 = vrot.slane %v2488_v46, %v3673_v54 }
 0x443   : > { %2501 = vst.msk [vmem:[%s411_s19] sm:$0xf] %vm3684_vm2, %v2495_v25 }
 0x444 PF: > { %s22_s15 = sadd.s32 1, %s3250_s15   ;;  %s3748_s13 = smov %s3246_s14 }
 0x445   : > { %p19_p4 = scmp.ge.s32.totalorder %s22_s15, 4   ;;  %s3749_s14 = smov %s3751_s17 }
 0x447   :  { %21 = sbr.rel (!%p19_p4) target bundleno = 2 (0x2), region = 115 }
 0x44e   :  { %2535 = vsyncpa [#allocation3], 1 }
 0x44f   :  { %2537 = vsyncpa [#allocation3 + $0x1], 1 }

</bundles_post_ra>
